<compile_context>
chip_gen: v7x
topology: tpu7x:2x2x1
jax: 0.10.0
libtpu: 0.0.40
codegen_flags: <defaults>
</compile_context>

<pallas_src>
import functools
import math

import numpy as np
import jax
import jax.numpy as jnp
from jax.experimental import pallas as pl
from jax.experimental.pallas import tpu as pltpu

# ----------------------------- config -------------------------------------
B = 2
T_TEXT = 8
T_MEL = 16
N_MELS = 16
HIDDEN = 32            # encoder_hidden == decoder_hidden
NUM_HEADS = 2
CONV_FILTER = 64       # FFT conv filter size (kernels 9, 1)
VP_FILTER = 32         # variance predictor filter (kernel 3)
LATENT = 4             # acoustic_encoder latent_dim
N_BINS = 16            # pitch / energy bins
PN_CH = 32             # postnet channels (kernel 5, 5 layers)
N_SPK = 4
VOCAB = 20
USE_PHN_PRED_STEP = 100
EPS = 1e-5

# ----------------------- pallas_call plumbing ------------------------------

def _full_spec(shape):
    nd = len(shape)
    return pl.BlockSpec(tuple(shape), lambda *_: (0,) * nd)


def _call(kernel, args, out_shape):
    """Single-step grid, every operand as one VMEM-resident block."""
    return pl.pallas_call(
        kernel,
        out_shape=out_shape,
        grid=(1,),
        in_specs=[_full_spec(a.shape) for a in args],
        out_specs=_full_spec(out_shape.shape),
        compiler_params=pltpu.CompilerParams(dimension_semantics=("arbitrary",)),
    )(*args)


def _call_multi(kernel, args, out_shapes):
    """Single-step grid, multiple whole-array outputs."""
    return pl.pallas_call(
        kernel,
        out_shape=tuple(out_shapes),
        grid=(1,),
        in_specs=[_full_spec(a.shape) for a in args],
        out_specs=tuple(_full_spec(o.shape) for o in out_shapes),
        compiler_params=pltpu.CompilerParams(dimension_semantics=("arbitrary",)),
    )(*args)


def _r2(v):
    return v.reshape(1, -1)


# ------------------------- in-kernel helpers --------------------------------

def _conv1d_im2col(x3, w_ref, b_ref, relu):
    """Same-padded 1-D conv over time for x3 (B, T, Cin).

    Built as an in-VMEM im2col (zero-pad in time, concat K shifted views along
    lanes) followed by ONE (B*T, K*Cin) @ (K*Cin, Cout) MXU matmul."""
    Bc, T, Cin = x3.shape
    K, _, Cout = w_ref.shape
    if K == 1:
        cols2 = x3.reshape(Bc * T, Cin)
        w2 = w_ref[...].reshape(Cin, Cout)
    else:
        pad = (K - 1) // 2
        z = jnp.zeros((Bc, pad, Cin), jnp.float32)
        xp = jnp.concatenate([z, x3, z], axis=1)              # (B, T+K-1, Cin)
        cols = jnp.concatenate([xp[:, k:k + T, :] for k in range(K)], axis=-1)
        cols2 = cols.reshape(Bc * T, K * Cin)
        w2 = w_ref[...].reshape(K * Cin, Cout)
    out = jnp.dot(cols2, w2, preferred_element_type=jnp.float32) + b_ref[...]
    if relu:
        out = jnp.maximum(out, 0.0)
    return out                                                 # (B*T, Cout)


def _ln_lastdim(x, g, b, eps):
    mu = jnp.mean(x, axis=-1, keepdims=True)
    var = jnp.mean(jnp.square(x - mu), axis=-1, keepdims=True)
    return (x - mu) * jax.lax.rsqrt(var + eps) * g + b


def _conv_stack(x3, ws, eps):
    """[conv3 + ReLU + LN] x 2 as used by every predictor/encoder stack."""
    w1, b1, g1, be1, w2, b2, g2, be2 = ws
    Bc, T, _ = x3.shape
    h = _conv1d_im2col(x3, w1, b1, relu=True)
    h = _ln_lastdim(h, g1[...], be1[...], eps)
    h = _conv1d_im2col(h.reshape(Bc, T, w1.shape[2]), w2, b2, relu=True)
    h = _ln_lastdim(h, g2[...], be2[...], eps)
    return h                                                   # (B*T, F)


# --------------------------- fused kernels ----------------------------------

def _fft_block_kernel(x_ref, pad_ref, keep_ref, spk_ref,
                      wqkv_ref, bqkv_ref, wo_ref, bo_ref,
                      wc1_ref, bc1_ref, wc2_ref, bc2_ref,
                      ws1_ref, bs1_ref, wb1_ref, bb1_ref,
                      ws2_ref, bs2_ref, wb2_ref, bb2_ref,
                      o_ref, *, nh, eps):
    """One full FFT block (attention sub-layer + conv sub-layer), fused."""
    Bc, T, H = x_ref.shape
    dh = H // nh
    inv_sqrt_dh = 1.0 / math.sqrt(dh)

    x = x_ref[...]                       # (B, T, H)
    pad = pad_ref[...]                   # (B, T)   1.0 == padded
    keep3 = keep_ref[...]                # (B, T, 1) 1.0 == valid
    spk = spk_ref[...]                   # (B, H)

    # (conditional) LayerNorm scale/bias: one B x H matmul per norm
    # (for plain LN the ws/wb weights are zero so this reduces to gamma/beta).
    s1 = jnp.dot(spk, ws1_ref[...], preferred_element_type=jnp.float32) + bs1_ref[...]
    b1 = jnp.dot(spk, wb1_ref[...], preferred_element_type=jnp.float32) + bb1_ref[...]
    s2 = jnp.dot(spk, ws2_ref[...], preferred_element_type=jnp.float32) + bs2_ref[...]
    b2 = jnp.dot(spk, wb2_ref[...], preferred_element_type=jnp.float32) + bb2_ref[...]

    # fused QKV projection (single (H, 3H) matmul)
    x2 = x.reshape(Bc * T, H)
    qkv = jnp.dot(x2, wqkv_ref[...], preferred_element_type=jnp.float32) + bqkv_ref[...]

    neg = jnp.where(pad[:, None, :] > 0.5, -1e9, 0.0)   # (B, 1, T) key mask
    heads = []
    for hi in range(nh):
        q = qkv[:, hi * dh:(hi + 1) * dh].reshape(Bc, T, dh)
        k = qkv[:, H + hi * dh:H + (hi + 1) * dh].reshape(Bc, T, dh)
        v = qkv[:, 2 * H + hi * dh:2 * H + (hi + 1) * dh].reshape(Bc, T, dh)
        s = jnp.einsum('bqd,bkd->bqk', q, k, preferred_element_type=jnp.float32)
        s = s * inv_sqrt_dh + neg
        s = s - jnp.max(s, axis=-1, keepdims=True)
        p = jnp.exp(s)
        p = p * pl.reciprocal(jnp.sum(p, axis=-1, keepdims=True), approx=True)
        a = jnp.einsum('bqk,bkd->bqd', p, v, preferred_element_type=jnp.float32)
        heads.append(a.reshape(Bc * T, dh))
    att = jnp.concatenate(heads, axis=-1) if nh > 1 else heads[0]

    # output projection + residual + (cond) LN + pad masking
    o = jnp.dot(att, wo_ref[...], preferred_element_type=jnp.float32) + bo_ref[...] + x2
    o3 = o.reshape(Bc, T, H)
    mu = jnp.mean(o3, axis=-1, keepdims=True)
    var = jnp.mean(jnp.square(o3 - mu), axis=-1, keepdims=True)
    o3 = ((o3 - mu) * jax.lax.rsqrt(var + eps) * s1[:, None, :] + b1[:, None, :]) * keep3

    # conv sub-layer: conv(k=9, H->F) + ReLU, conv(k=1, F->H), residual, LN, mask
    h = _conv1d_im2col(o3, wc1_ref, bc1_ref, relu=True)
    h = _conv1d_im2col(h.reshape(Bc, T, wc1_ref.shape[2]), wc2_ref, bc2_ref, relu=False)
    o2 = (h + o3.reshape(Bc * T, H)).reshape(Bc, T, H)
    mu = jnp.mean(o2, axis=-1, keepdims=True)
    var = jnp.mean(jnp.square(o2 - mu), axis=-1, keepdims=True)
    o2 = ((o2 - mu) * jax.lax.rsqrt(var + eps) * s2[:, None, :] + b2[:, None, :]) * keep3
    o_ref[...] = o2


def _make_acoustic_kernel(use_pred, eps=EPS):
    """Fused phoneme-level predictor + phoneme-level encoder + utterance
    encoder: one launch, up to three outputs."""
    def kernel(*refs):
        i = 0
        if use_pred:
            enc_ref = refs[i]; i += 1
        mwp_ref = refs[i]; mels_ref = refs[i + 1]; i += 2
        if use_pred:
            pred_ws = refs[i:i + 10]; i += 10
        phn_ws = refs[i:i + 10]; i += 10
        utt_ws = refs[i:i + 8]; i += 8
        outs = refs[i:]
        oi = 0
        if use_pred:
            pred_out = outs[oi]; oi += 1
        phn_out, utter_out = outs[oi], outs[oi + 1]

        if use_pred:
            Bc, T, _ = enc_ref.shape
            h = _conv_stack(enc_ref[...], pred_ws[:8], eps)
            wl, bl = pred_ws[8], pred_ws[9]
            pred_out[...] = (jnp.dot(h, wl[...], preferred_element_type=jnp.float32)
                             + bl[...]).reshape(Bc, T, -1)

        Bc, T, _ = mwp_ref.shape
        h = _conv_stack(mwp_ref[...], phn_ws[:8], eps)
        wl, bl = phn_ws[8], phn_ws[9]
        phn_out[...] = (jnp.dot(h, wl[...], preferred_element_type=jnp.float32)
                        + bl[...]).reshape(Bc, T, -1)

        # UtteranceEncoder: [conv3 + ReLU + LN] x2 + mean-pool over time.
        # TODO(synk): padded mel frames are included in the mean (matches prior impl).
        Bm, Tm, _ = mels_ref.shape
        hu = _conv_stack(mels_ref[...], utt_ws, eps)
        utter_out[...] = jnp.mean(hu.reshape(Bm, Tm, -1), axis=1)
    return kernel


def _variance_adaptor_kernel(*refs, eps):
    """Duration + pitch + energy predictors, pitch/energy bucketise+embed and
    the residual adds, all in one launch."""
    (x_ref, keep_ref, p_t_ref, e_t_ref, pbins_ref, ebins_ref,
     pemb_ref, eemb_ref) = refs[:8]
    dur_ws = refs[8:18]
    pit_ws = refs[18:28]
    ene_ws = refs[28:38]
    o_ref, d_ref, p_ref, e_ref = refs[38:42]

    Bc, T, H = x_ref.shape
    x3 = x_ref[...]
    keep2 = keep_ref[...].reshape(Bc * T, 1)

    def predictor(x3_, ws):
        h = _conv_stack(x3_, ws[:8], eps)
        wl, bl = ws[8], ws[9]
        out = jnp.dot(h, wl[...], preferred_element_type=jnp.float32) + bl[...]
        return out * keep2                                     # (B*T, 1)

    def embed(t_ref, bins_ref, emb_ref):
        # torch.bucketize(t, bins) == #{j : bins[j] < t}  (side='left')
        t = t_ref[...]                                         # (B, T, 1)
        nb1 = bins_ref.shape[1]
        bins = bins_ref[...].reshape(1, 1, nb1)
        idx = jnp.sum((t > bins).astype(jnp.int32), axis=-1, keepdims=True)
        nb = emb_ref.shape[0]
        onehot = (idx == jax.lax.broadcasted_iota(jnp.int32, (Bc, T, nb), 2)
                  ).astype(jnp.float32)
        return jnp.dot(onehot.reshape(Bc * T, nb), emb_ref[...],
                       preferred_element_type=jnp.float32)     # (B*T, H)

    log_d = predictor(x3, dur_ws)
    p_pred = predictor(x3, pit_ws)

    x2 = x3.reshape(Bc * T, H) + embed(p_t_ref, pbins_ref, pemb_ref)
    e_pred = predictor(x2.reshape(Bc, T, H), ene_ws)
    x2 = x2 + embed(e_t_ref, ebins_ref, eemb_ref)

    o_ref[...] = x2.reshape(Bc, T, H)
    d_ref[...] = log_d.reshape(Bc, T, 1)
    p_ref[...] = p_pred.reshape(Bc, T, 1)
    e_ref[...] = e_pred.reshape(Bc, T, 1)


def _mel_postnet_kernel(*refs, eps):
    """mel_linear + ConditionalLayerNorm(n_mels) + full 5-layer postnet
    (+ residual), fused; two outputs (mel, postnet_output)."""
    (x_ref, spk_ref, wm, bm, ws, bs, wb, bb) = refs[:8]
    n_layers = (len(refs) - 10) // 4
    pn = refs[8:8 + 4 * n_layers]
    mel_ref, post_ref = refs[-2], refs[-1]

    Bc, T, H = x_ref.shape
    M = wm.shape[1]
    x2 = x_ref[...].reshape(Bc * T, H)
    mel = jnp.dot(x2, wm[...], preferred_element_type=jnp.float32) + bm[...]

    spk = spk_ref[...]
    scale = jnp.dot(spk, ws[...], preferred_element_type=jnp.float32) + bs[...]
    bias = jnp.dot(spk, wb[...], preferred_element_type=jnp.float32) + bb[...]
    mel3 = mel.reshape(Bc, T, M)
    mu = jnp.mean(mel3, axis=-1, keepdims=True)
    var = jnp.mean(jnp.square(mel3 - mu), axis=-1, keepdims=True)
    mel3 = ((mel3 - mu) * jax.lax.rsqrt(var + eps) * scale[:, None, :]
            + bias[:, None, :])
    mel_ref[...] = mel3

    h2 = mel3.reshape(Bc * T, M)
    h = h2
    for li in range(n_layers):
        w, b, g, be = pn[4 * li:4 * li + 4]
        h = _conv1d_im2col(h.reshape(Bc, T, w.shape[1]), w, b, relu=False)
        # TODO(synk): training-mode batch stats over the (B*T, C) slab (matches the
        # previous implementation; PyTorch eval mode would use running stats).
        mu = jnp.mean(h, axis=0, keepdims=True)
        var = jnp.mean(jnp.square(h - mu), axis=0, keepdims=True)
        h = (h - mu) * jax.lax.rsqrt(var + eps) * g[...] + be[...]
        if li < n_layers - 1:
            h = jnp.tanh(h)
    post_ref[...] = (h + h2).reshape(Bc, T, M)


# --------------------------- kernel wrappers --------------------------------

def fft_block(x, pad_f, keep3, p, spk_rows):
    args = [x, pad_f, keep3, spk_rows,
            p["wqkv"], _r2(p["bqkv"]), p["wo"], _r2(p["bo"]),
            p["wc1"], _r2(p["bc1"]), p["wc2"], _r2(p["bc2"]),
            p["ln1"]["ws"], _r2(p["ln1"]["bs"]), p["ln1"]["wb"], _r2(p["ln1"]["bb"]),
            p["ln2"]["ws"], _r2(p["ln2"]["bs"]), p["ln2"]["wb"], _r2(p["ln2"]["bb"])]
    return _call(functools.partial(_fft_block_kernel, nh=NUM_HEADS, eps=EPS),
                 args, jax.ShapeDtypeStruct(x.shape, jnp.float32))


def _conv_stack_args(cs):
    return [cs["w1"], _r2(cs["b1"]), _r2(cs["g1"]), _r2(cs["be1"]),
            cs["w2"], _r2(cs["b2"]), _r2(cs["g2"]), _r2(cs["be2"])]


def acoustic_encoders(enc_out, mel_wrt_phonemes, mels, params, use_pred):
    """One launch for phoneme_lv_predictor / phoneme_lv_encoder / utter_encoder.

    The phone_level_emb Linear(LATENT -> H) is folded into the predictor /
    encoder output heads (parameter glue, done once per call)."""
    ple_w, ple_b = params["ple_w"], params["ple_b"]

    def folded(cs):
        return _conv_stack_args(cs) + [jnp.dot(cs["wl"], ple_w),
                                       _r2(jnp.dot(cs["bl"], ple_w) + ple_b)]

    Bc, Tt, _ = mel_wrt_phonemes.shape
    args, out_shapes = [], []
    if use_pred:
        args.append(enc_out)
    args += [mel_wrt_phonemes, mels]
    if use_pred:
        args += folded(params["phn_predictor"])
        out_shapes.append(jax.ShapeDtypeStruct((Bc, Tt, HIDDEN), jnp.float32))
    args += folded(params["phn_encoder"])
    args += _conv_stack_args(params["utter"])
    out_shapes += [jax.ShapeDtypeStruct((Bc, Tt, HIDDEN), jnp.float32),
                   jax.ShapeDtypeStruct((Bc, HIDDEN), jnp.float32)]

    outs = _call_multi(_make_acoustic_kernel(use_pred), args, out_shapes)
    if use_pred:
        pred_phn, phn, utter = outs
    else:
        phn, utter = outs
        pred_phn = None
    return pred_phn, phn, utter


def variance_adaptor_call(x, keep3, p_targets, e_targets, va):
    Bc, Tt, H = x.shape

    def full(cs):
        return _conv_stack_args(cs) + [cs["wl"], _r2(cs["bl"])]

    args = [x, keep3, p_targets[:, :, None], e_targets[:, :, None],
            _r2(va["pitch_bins"]), _r2(va["energy_bins"]),
            va["pitch_emb"], va["energy_emb"]]
    args += full(va["duration"]) + full(va["pitch"]) + full(va["energy"])
    out_shapes = [jax.ShapeDtypeStruct((Bc, Tt, H), jnp.float32),
                  jax.ShapeDtypeStruct((Bc, Tt, 1), jnp.float32),
                  jax.ShapeDtypeStruct((Bc, Tt, 1), jnp.float32),
                  jax.ShapeDtypeStruct((Bc, Tt, 1), jnp.float32)]
    out, log_d, p_pred, e_pred = _call_multi(
        functools.partial(_variance_adaptor_kernel, eps=EPS), args, out_shapes)
    return out, log_d[..., 0], p_pred[..., 0], e_pred[..., 0]


def mel_and_postnet(dec_out, spk, params):
    Bc, Tm, _ = dec_out.shape
    cln = params["out_cln"]
    args = [dec_out, spk, params["mel_w"], _r2(params["mel_b"]),
            cln["ws"], _r2(cln["bs"]), cln["wb"], _r2(cln["bb"])]
    for (w, b, g, be) in params["postnet"]["layers"]:
        args += [w, _r2(b), _r2(g), _r2(be)]
    out_shapes = [jax.ShapeDtypeStruct((Bc, Tm, N_MELS), jnp.float32),
                  jax.ShapeDtypeStruct((Bc, Tm, N_MELS), jnp.float32)]
    return _call_multi(functools.partial(_mel_postnet_kernel, eps=EPS),
                       args, out_shapes)


# --------------------------- model glue (XLA) -------------------------------

def get_mask_from_lengths(lens, max_len):
    return jnp.arange(max_len)[None, :] >= lens[:, None]   # True = padded


@functools.lru_cache(maxsize=None)
def sinusoid_table(T, d):
    # static table -> precomputed on host once (no per-call XLA transcendentals)
    pos = np.arange(T, dtype=np.float32)[:, None]
    i = np.arange(d, dtype=np.float32)[None, :]
    angle = pos / np.power(10000.0, (2.0 * np.floor(i / 2.0)) / d)
    tab = np.where((np.arange(d)[None, :] % 2) == 0, np.sin(angle), np.cos(angle))
    return jnp.asarray(tab, dtype=jnp.float32)


def length_regulate(x, durations, max_len):
    # data-dependent expansion as JAX glue (gather); no clean BlockSpec form
    Bc, Tt, _ = x.shape
    cum = jnp.cumsum(durations, axis=1)
    pos = jnp.arange(max_len)
    idx = jnp.sum(pos[None, :, None] >= cum[:, None, :], axis=-1)
    idx = jnp.clip(idx, 0, Tt - 1)
    out = jnp.take_along_axis(x, idx[:, :, None], axis=1)
    mel_len = cum[:, -1]
    out = jnp.where((pos[None, :] < mel_len[:, None])[:, :, None], out, 0.0)
    return out, mel_len


# --------------------------- parameter init --------------------------------

class PG:
    def __init__(self, seed):
        self.key = jax.random.PRNGKey(seed)

    def n(self, *shape, scale=0.1):
        self.key, sub = jax.random.split(self.key)
        return (scale * jax.random.normal(sub, shape)).astype(jnp.float32)


def init_params():
    g = PG(42)
    H, M, F, VF, L = HIDDEN, N_MELS, CONV_FILTER, VP_FILTER, LATENT
    zeros = lambda d: jnp.zeros((d,), jnp.float32)
    ones = lambda d: jnp.ones((d,), jnp.float32)
    zmat = lambda a, b: jnp.zeros((a, b), jnp.float32)
    cln = lambda din, dout: {"ws": g.n(din, dout), "bs": ones(dout),
                             "wb": g.n(din, dout), "bb": zeros(dout)}
    # plain LN in the unified (conditional) form: zero speaker weights
    plain_ln = lambda dout: {"ws": zmat(H, dout), "bs": ones(dout),
                             "wb": zmat(H, dout), "bb": zeros(dout)}

    def fft_layer(cond):
        p = {"wqkv": g.n(H, 3 * H), "bqkv": zeros(3 * H),
             "wo": g.n(H, H), "bo": zeros(H),
             "wc1": g.n(9, H, F), "bc1": zeros(F),
             "wc2": g.n(1, F, H), "bc2": zeros(H)}
        p["ln1"] = cln(H, H) if cond else plain_ln(H)
        p["ln2"] = cln(H, H) if cond else plain_ln(H)
        return p

    def conv_stack(in_dim, out_dim, filt=VF):
        return {"w1": g.n(3, in_dim, filt), "b1": zeros(filt), "g1": ones(filt), "be1": zeros(filt),
                "w2": g.n(3, filt, filt), "b2": zeros(filt), "g2": ones(filt), "be2": zeros(filt),
                "wl": g.n(filt, out_dim), "bl": zeros(out_dim)}

    word_emb = g.n(VOCAB, H).at[0].set(0.0)   # padding_idx = 0

    pn_layers = [(g.n(5, M, PN_CH), zeros(PN_CH), ones(PN_CH), zeros(PN_CH))]
    for _ in range(3):
        pn_layers.append((g.n(5, PN_CH, PN_CH), zeros(PN_CH), ones(PN_CH), zeros(PN_CH)))
    pn_layers.append((g.n(5, PN_CH, M), zeros(M), ones(M), zeros(M)))

    return {
        "encoder": {"word_emb": word_emb, "layers": [fft_layer(False)]},
        "decoder": {"layers": [fft_layer(True)]},   # conditional LN in decoder
        "va": {"duration": conv_stack(H, 1), "pitch": conv_stack(H, 1),
               "energy": conv_stack(H, 1),
               "pitch_bins": jnp.linspace(-1.0, 1.0, N_BINS - 1, dtype=jnp.float32),
               "energy_bins": jnp.linspace(-1.0, 1.0, N_BINS - 1, dtype=jnp.float32),
               "pitch_emb": g.n(N_BINS, H), "energy_emb": g.n(N_BINS, H)},
        "phn_encoder": conv_stack(M, LATENT),
        "phn_predictor": conv_stack(H, LATENT),
        "utter": {"w1": g.n(3, M, H), "b1": zeros(H), "g1": ones(H), "be1": zeros(H),
                  "w2": g.n(3, H, H), "b2": zeros(H), "g2": ones(H), "be2": zeros(H)},
        "ple_w": g.n(LATENT, H), "ple_b": zeros(H),
        "spk_emb": g.n(N_SPK, H),
        "mel_w": g.n(H, M), "mel_b": zeros(M),
        "out_cln": cln(H, M),
        "postnet": {"layers": pn_layers},
    }


# ------------------------------ forward ------------------------------------

def adaspeech1_forward(params, speakers, texts, text_lens, max_text_len,
                       mels, mel_wrt_phonemes, mel_lens, max_mel_len,
                       p_targets, e_targets, d_targets, global_step):
    src_masks = get_mask_from_lengths(text_lens, max_text_len)
    mel_masks = get_mask_from_lengths(mel_lens, max_mel_len)
    src_pad = src_masks.astype(jnp.float32)              # (B, Tt) 1.0 = padded
    mel_pad = mel_masks.astype(jnp.float32)
    src_keep3 = (1.0 - src_pad)[:, :, None]
    mel_keep3 = (1.0 - mel_pad)[:, :, None]

    Bc = texts.shape[0]
    zero_spk = jnp.zeros((Bc, HIDDEN), jnp.float32)

    # ---------------- encoder (launch 1) ----------------
    x = jnp.take(params["encoder"]["word_emb"], texts, axis=0)
    x = x + sinusoid_table(texts.shape[1], HIDDEN)[None]
    x = x * src_keep3
    for lp in params["encoder"]["layers"]:
        x = fft_block(x, src_pad, src_keep3, lp, zero_spk)
    output = x

    # ---------------- acoustic encoders (launch 2) ----------------
    use_pred = global_step >= USE_PHN_PRED_STEP
    pred_phn, phn, utter = acoustic_encoders(output, mel_wrt_phonemes, mels,
                                             params, use_pred)
    output = output + phn
    output = output + utter[:, None, :]

    speaker_emb = jnp.take(params["spk_emb"], speakers, axis=0)
    output = output + speaker_emb[:, None, :]

    # ---------------- variance adaptor (launch 3) ----------------
    output, log_d_pred, p_pred, e_pred = variance_adaptor_call(
        output, src_keep3, p_targets, e_targets, params["va"])
    output, mel_lens_out = length_regulate(output, d_targets, max_mel_len)

    # ---------------- decoder (launch 4) ----------------
    x = output + sinusoid_table(output.shape[1], HIDDEN)[None]
    for lp in params["decoder"]["layers"]:
        x = fft_block(x, mel_pad, mel_keep3, lp, speaker_emb)
    dec_out = x

    # ---------------- mel head + postnet (launch 5) ----------------
    mel, postnet_output = mel_and_postnet(dec_out, speaker_emb, params)

    return (mel, postnet_output, p_pred, e_pred, log_d_pred, d_targets,
            src_masks, mel_masks, text_lens, mel_lens_out, phn, pred_phn)


# ------------------------------- main ---------------------------------------

if __name__ == "__main__":
    key = jax.random.PRNGKey(0)
    k1, k2, k3, k4, k5 = jax.random.split(key, 5)

    params = init_params()

    speakers = jnp.array([0, 3], dtype=jnp.int32)
    texts = jax.random.randint(k1, (B, T_TEXT), 1, VOCAB, dtype=jnp.int32)
    text_lens = jnp.array([T_TEXT, 6], dtype=jnp.int32)
    mels = jax.random.normal(k2, (B, T_MEL, N_MELS), dtype=jnp.float32)
    mel_wrt_phonemes = jax.random.normal(k3, (B, T_TEXT, N_MELS), dtype=jnp.float32)
    p_targets = jax.random.normal(k4, (B, T_TEXT), dtype=jnp.float32)
    e_targets = jax.random.normal(k5, (B, T_TEXT), dtype=jnp.float32)

    src_pad = jnp.arange(T_TEXT)[None, :] >= text_lens[:, None]
    d_targets = jnp.where(src_pad, 0, 2).astype(jnp.int32)        # sums: [16, 12]
    mel_lens = jnp.sum(d_targets, axis=1)
    max_mel_len = T_MEL

    outputs = adaspeech1_forward(
        params, speakers, texts, text_lens, T_TEXT,
        mels, mel_wrt_phonemes, mel_lens, max_mel_len,
        p_targets, e_targets, d_targets, global_step=200)

    outputs = jax.block_until_ready(outputs)
    mel_out, post_out = outputs[0], outputs[1]
    assert mel_out.shape == (B, T_MEL, N_MELS)
    assert post_out.shape == (B, T_MEL, N_MELS)
    assert all(jnp.all(jnp.isfinite(o)) for o in (mel_out, post_out))
    assert outputs[2].shape == (B, T_TEXT) and outputs[4].shape == (B, T_TEXT)
    print("KERNEL_OK")
</pallas_src>

<mosaic_0001>
module attributes {stable_mosaic.version = 11 : i64} {
  func.func @_fft_block_kernel(%arg0: i32, %arg1: memref<2x8x32xf32, #tpu.memory_space<vmem>>, %arg2: memref<2x8xf32, #tpu.memory_space<vmem>>, %arg3: memref<2x8x1xf32, #tpu.memory_space<vmem>>, %arg4: memref<2x32xf32, #tpu.memory_space<vmem>>, %arg5: memref<32x96xf32, #tpu.memory_space<vmem>>, %arg6: memref<1x96xf32, #tpu.memory_space<vmem>>, %arg7: memref<32x32xf32, #tpu.memory_space<vmem>>, %arg8: memref<1x32xf32, #tpu.memory_space<vmem>>, %arg9: memref<9x32x64xf32, #tpu.memory_space<vmem>>, %arg10: memref<1x64xf32, #tpu.memory_space<vmem>>, %arg11: memref<1x64x32xf32, #tpu.memory_space<vmem>>, %arg12: memref<1x32xf32, #tpu.memory_space<vmem>>, %arg13: memref<32x32xf32, #tpu.memory_space<vmem>>, %arg14: memref<1x32xf32, #tpu.memory_space<vmem>>, %arg15: memref<32x32xf32, #tpu.memory_space<vmem>>, %arg16: memref<1x32xf32, #tpu.memory_space<vmem>>, %arg17: memref<32x32xf32, #tpu.memory_space<vmem>>, %arg18: memref<1x32xf32, #tpu.memory_space<vmem>>, %arg19: memref<32x32xf32, #tpu.memory_space<vmem>>, %arg20: memref<1x32xf32, #tpu.memory_space<vmem>>, %arg21: memref<2x8x32xf32, #tpu.memory_space<vmem>>) attributes {dimension_semantics = [#tpu.dimension_semantics<arbitrary>], iteration_bounds = array<i64: 1>, scalar_prefetch = 0 : i64, scratch_operands = 0 : i64, tpu.core_type = #tpu.core_type<tc>, window_params = [{pipeline_mode = #tpu.pipeline_mode<synchronous>, transform_indices = @transform_0, window_bounds = array<i64: 2, 8, 32>}, {pipeline_mode = #tpu.pipeline_mode<synchronous>, transform_indices = @transform_1, window_bounds = array<i64: 2, 8>}, {pipeline_mode = #tpu.pipeline_mode<synchronous>, transform_indices = @transform_2, window_bounds = array<i64: 2, 8, 1>}, {pipeline_mode = #tpu.pipeline_mode<synchronous>, transform_indices = @transform_3, window_bounds = array<i64: 2, 32>}, {pipeline_mode = #tpu.pipeline_mode<synchronous>, transform_indices = @transform_4, window_bounds = array<i64: 32, 96>}, {pipeline_mode = #tpu.pipeline_mode<synchronous>, transform_indices = @transform_5, window_bounds = array<i64: 1, 96>}, {pipeline_mode = #tpu.pipeline_mode<synchronous>, transform_indices = @transform_6, window_bounds = array<i64: 32, 32>}, {pipeline_mode = #tpu.pipeline_mode<synchronous>, transform_indices = @transform_7, window_bounds = array<i64: 1, 32>}, {pipeline_mode = #tpu.pipeline_mode<synchronous>, transform_indices = @transform_8, window_bounds = array<i64: 9, 32, 64>}, {pipeline_mode = #tpu.pipeline_mode<synchronous>, transform_indices = @transform_9, window_bounds = array<i64: 1, 64>}, {pipeline_mode = #tpu.pipeline_mode<synchronous>, transform_indices = @transform_10, window_bounds = array<i64: 1, 64, 32>}, {pipeline_mode = #tpu.pipeline_mode<synchronous>, transform_indices = @transform_11, window_bounds = array<i64: 1, 32>}, {pipeline_mode = #tpu.pipeline_mode<synchronous>, transform_indices = @transform_12, window_bounds = array<i64: 32, 32>}, {pipeline_mode = #tpu.pipeline_mode<synchronous>, transform_indices = @transform_13, window_bounds = array<i64: 1, 32>}, {pipeline_mode = #tpu.pipeline_mode<synchronous>, transform_indices = @transform_14, window_bounds = array<i64: 32, 32>}, {pipeline_mode = #tpu.pipeline_mode<synchronous>, transform_indices = @transform_15, window_bounds = array<i64: 1, 32>}, {pipeline_mode = #tpu.pipeline_mode<synchronous>, transform_indices = @transform_16, window_bounds = array<i64: 32, 32>}, {pipeline_mode = #tpu.pipeline_mode<synchronous>, transform_indices = @transform_17, window_bounds = array<i64: 1, 32>}, {pipeline_mode = #tpu.pipeline_mode<synchronous>, transform_indices = @transform_18, window_bounds = array<i64: 32, 32>}, {pipeline_mode = #tpu.pipeline_mode<synchronous>, transform_indices = @transform_19, window_bounds = array<i64: 1, 32>}, {pipeline_mode = #tpu.pipeline_mode<synchronous>, transform_indices = @transform_20, window_bounds = array<i64: 2, 8, 32>}]} {
    %c0 = arith.constant 0 : index
    %c0_0 = arith.constant 0 : index
    %c0_1 = arith.constant 0 : index
    %0 = vector.load %arg1[%c0, %c0_0, %c0_1] : memref<2x8x32xf32, #tpu.memory_space<vmem>>, vector<2x8x32xf32>
    %c0_2 = arith.constant 0 : index
    %c0_3 = arith.constant 0 : index
    %1 = vector.load %arg2[%c0_2, %c0_3] : memref<2x8xf32, #tpu.memory_space<vmem>>, vector<2x8xf32>
    %c0_4 = arith.constant 0 : index
    %c0_5 = arith.constant 0 : index
    %c0_6 = arith.constant 0 : index
    %2 = vector.load %arg3[%c0_4, %c0_5, %c0_6] : memref<2x8x1xf32, #tpu.memory_space<vmem>>, vector<2x8x1xf32>
    %c0_7 = arith.constant 0 : index
    %c0_8 = arith.constant 0 : index
    %3 = vector.load %arg4[%c0_7, %c0_8] : memref<2x32xf32, #tpu.memory_space<vmem>>, vector<2x32xf32>
    %c0_9 = arith.constant 0 : index
    %c0_10 = arith.constant 0 : index
    %4 = vector.load %arg13[%c0_9, %c0_10] : memref<32x32xf32, #tpu.memory_space<vmem>>, vector<32x32xf32>
    %cst = arith.constant dense<0.000000e+00> : vector<2x32xf32>
    %5 = tpu.matmul %3, %4, %cst {dimension_numbers = #tpu.dot_dimension_numbers<[1], [0], [0], [1], [0, 0, 1, 1], [], []>} : vector<2x32xf32>, vector<32x32xf32>, vector<2x32xf32> -> vector<2x32xf32>
    %c0_11 = arith.constant 0 : index
    %c0_12 = arith.constant 0 : index
    %6 = vector.load %arg14[%c0_11, %c0_12] : memref<1x32xf32, #tpu.memory_space<vmem>>, vector<1x32xf32>
    %7 = vector.broadcast %6 : vector<1x32xf32> to vector<2x32xf32>
    %8 = arith.addf %5, %7 : vector<2x32xf32>
    %c0_13 = arith.constant 0 : index
    %c0_14 = arith.constant 0 : index
    %9 = vector.load %arg15[%c0_13, %c0_14] : memref<32x32xf32, #tpu.memory_space<vmem>>, vector<32x32xf32>
    %cst_15 = arith.constant dense<0.000000e+00> : vector<2x32xf32>
    %10 = tpu.matmul %3, %9, %cst_15 {dimension_numbers = #tpu.dot_dimension_numbers<[1], [0], [0], [1], [0, 0, 1, 1], [], []>} : vector<2x32xf32>, vector<32x32xf32>, vector<2x32xf32> -> vector<2x32xf32>
    %c0_16 = arith.constant 0 : index
    %c0_17 = arith.constant 0 : index
    %11 = vector.load %arg16[%c0_16, %c0_17] : memref<1x32xf32, #tpu.memory_space<vmem>>, vector<1x32xf32>
    %12 = vector.broadcast %11 : vector<1x32xf32> to vector<2x32xf32>
    %13 = arith.addf %10, %12 : vector<2x32xf32>
    %c0_18 = arith.constant 0 : index
    %c0_19 = arith.constant 0 : index
    %14 = vector.load %arg17[%c0_18, %c0_19] : memref<32x32xf32, #tpu.memory_space<vmem>>, vector<32x32xf32>
    %cst_20 = arith.constant dense<0.000000e+00> : vector<2x32xf32>
    %15 = tpu.matmul %3, %14, %cst_20 {dimension_numbers = #tpu.dot_dimension_numbers<[1], [0], [0], [1], [0, 0, 1, 1], [], []>} : vector<2x32xf32>, vector<32x32xf32>, vector<2x32xf32> -> vector<2x32xf32>
    %c0_21 = arith.constant 0 : index
    %c0_22 = arith.constant 0 : index
    %16 = vector.load %arg18[%c0_21, %c0_22] : memref<1x32xf32, #tpu.memory_space<vmem>>, vector<1x32xf32>
    %17 = vector.broadcast %16 : vector<1x32xf32> to vector<2x32xf32>
    %18 = arith.addf %15, %17 : vector<2x32xf32>
    %c0_23 = arith.constant 0 : index
    %c0_24 = arith.constant 0 : index
    %19 = vector.load %arg19[%c0_23, %c0_24] : memref<32x32xf32, #tpu.memory_space<vmem>>, vector<32x32xf32>
    %cst_25 = arith.constant dense<0.000000e+00> : vector<2x32xf32>
    %20 = tpu.matmul %3, %19, %cst_25 {dimension_numbers = #tpu.dot_dimension_numbers<[1], [0], [0], [1], [0, 0, 1, 1], [], []>} : vector<2x32xf32>, vector<32x32xf32>, vector<2x32xf32> -> vector<2x32xf32>
    %c0_26 = arith.constant 0 : index
    %c0_27 = arith.constant 0 : index
    %21 = vector.load %arg20[%c0_26, %c0_27] : memref<1x32xf32, #tpu.memory_space<vmem>>, vector<1x32xf32>
    %22 = vector.broadcast %21 : vector<1x32xf32> to vector<2x32xf32>
    %23 = arith.addf %20, %22 : vector<2x32xf32>
    %24 = vector.shape_cast %0 : vector<2x8x32xf32> to vector<16x32xf32>
    %c0_28 = arith.constant 0 : index
    %c0_29 = arith.constant 0 : index
    %25 = vector.load %arg5[%c0_28, %c0_29] : memref<32x96xf32, #tpu.memory_space<vmem>>, vector<32x96xf32>
    %cst_30 = arith.constant dense<0.000000e+00> : vector<16x96xf32>
    %26 = tpu.matmul %24, %25, %cst_30 {dimension_numbers = #tpu.dot_dimension_numbers<[1], [0], [0], [1], [0, 0, 1, 1], [], []>} : vector<16x32xf32>, vector<32x96xf32>, vector<16x96xf32> -> vector<16x96xf32>
    %c0_31 = arith.constant 0 : index
    %c0_32 = arith.constant 0 : index
    %27 = vector.load %arg6[%c0_31, %c0_32] : memref<1x96xf32, #tpu.memory_space<vmem>>, vector<1x96xf32>
    %28 = vector.broadcast %27 : vector<1x96xf32> to vector<16x96xf32>
    %29 = arith.addf %26, %28 : vector<16x96xf32>
    %30 = vector.shape_cast %1 : vector<2x8xf32> to vector<2x1x8xf32>
    %cst_33 = arith.constant 5.000000e-01 : f32
    %31 = vector.broadcast %cst_33 : f32 to vector<2x1x8xf32>
    %32 = arith.cmpf ogt, %30, %31 : vector<2x1x8xf32>
    %cst_34 = arith.constant -1.000000e+09 : f32
    %cst_35 = arith.constant 0.000000e+00 : f32
    %33 = vector.broadcast %cst_34 : f32 to vector<2x1x8xf32>
    %34 = vector.broadcast %cst_35 : f32 to vector<2x1x8xf32>
    %35 = arith.select %32, %33, %34 : vector<2x1x8xi1>, vector<2x1x8xf32>
    %36 = vector.extract_strided_slice %29 {offsets = [0, 0], sizes = [16, 16], strides = [1, 1]} : vector<16x96xf32> to vector<16x16xf32>
    %37 = vector.shape_cast %36 : vector<16x16xf32> to vector<2x8x16xf32>
    %38 = vector.extract_strided_slice %29 {offsets = [0, 32], sizes = [16, 16], strides = [1, 1]} : vector<16x96xf32> to vector<16x16xf32>
    %39 = vector.shape_cast %38 : vector<16x16xf32> to vector<2x8x16xf32>
    %40 = vector.extract_strided_slice %29 {offsets = [0, 64], sizes = [16, 16], strides = [1, 1]} : vector<16x96xf32> to vector<16x16xf32>
    %41 = vector.shape_cast %40 : vector<16x16xf32> to vector<2x8x16xf32>
    "tpu.trace_start"() <{level = 10 : i32, message = "bqd,bkd->bqk"}> : () -> ()
    %cst_36 = arith.constant dense<0.000000e+00> : vector<2x8x8xf32>
    %42 = tpu.matmul %37, %39, %cst_36 {dimension_numbers = #tpu.dot_dimension_numbers<[2], [2], [1], [1], [0, 0, 0, 1, 1, 1], [0], [0]>} : vector<2x8x16xf32>, vector<2x8x16xf32>, vector<2x8x8xf32> -> vector<2x8x8xf32>
    "tpu.trace_stop"() : () -> ()
    %cst_37 = arith.constant 2.500000e-01 : f32
    %43 = vector.broadcast %cst_37 : f32 to vector<2x8x8xf32>
    %44 = arith.mulf %42, %43 : vector<2x8x8xf32>
    %45 = vector.broadcast %35 : vector<2x1x8xf32> to vector<2x8x8xf32>
    %46 = arith.addf %44, %45 : vector<2x8x8xf32>
    %cst_38 = arith.constant dense<0xFF800000> : vector<2x8xf32>
    %47 = vector.multi_reduction <maximumf>, %46, %cst_38 [2] : vector<2x8x8xf32> to vector<2x8xf32>
    %48 = vector.shape_cast %47 : vector<2x8xf32> to vector<2x8x1xf32>
    %49 = vector.broadcast %48 : vector<2x8x1xf32> to vector<2x8x8xf32>
    %50 = arith.subf %46, %49 : vector<2x8x8xf32>
    %51 = math.exp %50 : vector<2x8x8xf32>
    %cst_39 = arith.constant dense<0.000000e+00> : vector<2x8xf32>
    %52 = vector.multi_reduction <add>, %51, %cst_39 [2] : vector<2x8x8xf32> to vector<2x8xf32>
    %53 = vector.shape_cast %52 : vector<2x8xf32> to vector<2x8x1xf32>
    %54 = tpu.reciprocal %53 {approx = true} : vector<2x8x1xf32> -> vector<2x8x1xf32>
    %55 = vector.broadcast %54 : vector<2x8x1xf32> to vector<2x8x8xf32>
    %56 = arith.mulf %51, %55 : vector<2x8x8xf32>
    "tpu.trace_start"() <{level = 10 : i32, message = "bqk,bkd->bqd"}> : () -> ()
    %cst_40 = arith.constant dense<0.000000e+00> : vector<2x8x16xf32>
    %57 = tpu.matmul %56, %41, %cst_40 {dimension_numbers = #tpu.dot_dimension_numbers<[2], [1], [1], [2], [0, 0, 0, 1, 1, 2], [0], [0]>} : vector<2x8x8xf32>, vector<2x8x16xf32>, vector<2x8x16xf32> -> vector<2x8x16xf32>
    "tpu.trace_stop"() : () -> ()
    %58 = vector.shape_cast %57 : vector<2x8x16xf32> to vector<16x16xf32>
    %59 = vector.extract_strided_slice %29 {offsets = [0, 16], sizes = [16, 16], strides = [1, 1]} : vector<16x96xf32> to vector<16x16xf32>
    %60 = vector.shape_cast %59 : vector<16x16xf32> to vector<2x8x16xf32>
    %61 = vector.extract_strided_slice %29 {offsets = [0, 48], sizes = [16, 16], strides = [1, 1]} : vector<16x96xf32> to vector<16x16xf32>
    %62 = vector.shape_cast %61 : vector<16x16xf32> to vector<2x8x16xf32>
    %63 = vector.extract_strided_slice %29 {offsets = [0, 80], sizes = [16, 16], strides = [1, 1]} : vector<16x96xf32> to vector<16x16xf32>
    %64 = vector.shape_cast %63 : vector<16x16xf32> to vector<2x8x16xf32>
    "tpu.trace_start"() <{level = 10 : i32, message = "bqd,bkd->bqk"}> : () -> ()
    %cst_41 = arith.constant dense<0.000000e+00> : vector<2x8x8xf32>
    %65 = tpu.matmul %60, %62, %cst_41 {dimension_numbers = #tpu.dot_dimension_numbers<[2], [2], [1], [1], [0, 0, 0, 1, 1, 1], [0], [0]>} : vector<2x8x16xf32>, vector<2x8x16xf32>, vector<2x8x8xf32> -> vector<2x8x8xf32>
    "tpu.trace_stop"() : () -> ()
    %cst_42 = arith.constant 2.500000e-01 : f32
    %66 = vector.broadcast %cst_42 : f32 to vector<2x8x8xf32>
    %67 = arith.mulf %65, %66 : vector<2x8x8xf32>
    %68 = vector.broadcast %35 : vector<2x1x8xf32> to vector<2x8x8xf32>
    %69 = arith.addf %67, %68 : vector<2x8x8xf32>
    %cst_43 = arith.constant dense<0xFF800000> : vector<2x8xf32>
    %70 = vector.multi_reduction <maximumf>, %69, %cst_43 [2] : vector<2x8x8xf32> to vector<2x8xf32>
    %71 = vector.shape_cast %70 : vector<2x8xf32> to vector<2x8x1xf32>
    %72 = vector.broadcast %71 : vector<2x8x1xf32> to vector<2x8x8xf32>
    %73 = arith.subf %69, %72 : vector<2x8x8xf32>
    %74 = math.exp %73 : vector<2x8x8xf32>
    %cst_44 = arith.constant dense<0.000000e+00> : vector<2x8xf32>
    %75 = vector.multi_reduction <add>, %74, %cst_44 [2] : vector<2x8x8xf32> to vector<2x8xf32>
    %76 = vector.shape_cast %75 : vector<2x8xf32> to vector<2x8x1xf32>
    %77 = tpu.reciprocal %76 {approx = true} : vector<2x8x1xf32> -> vector<2x8x1xf32>
    %78 = vector.broadcast %77 : vector<2x8x1xf32> to vector<2x8x8xf32>
    %79 = arith.mulf %74, %78 : vector<2x8x8xf32>
    "tpu.trace_start"() <{level = 10 : i32, message = "bqk,bkd->bqd"}> : () -> ()
    %cst_45 = arith.constant dense<0.000000e+00> : vector<2x8x16xf32>
    %80 = tpu.matmul %79, %64, %cst_45 {dimension_numbers = #tpu.dot_dimension_numbers<[2], [1], [1], [2], [0, 0, 0, 1, 1, 2], [0], [0]>} : vector<2x8x8xf32>, vector<2x8x16xf32>, vector<2x8x16xf32> -> vector<2x8x16xf32>
    "tpu.trace_stop"() : () -> ()
    %81 = vector.shape_cast %80 : vector<2x8x16xf32> to vector<16x16xf32>
    %82 = tpu.concatenate %58, %81 in 1 : vector<16x16xf32>, vector<16x16xf32> -> vector<16x32xf32>
    %c0_46 = arith.constant 0 : index
    %c0_47 = arith.constant 0 : index
    %83 = vector.load %arg7[%c0_46, %c0_47] : memref<32x32xf32, #tpu.memory_space<vmem>>, vector<32x32xf32>
    %cst_48 = arith.constant dense<0.000000e+00> : vector<16x32xf32>
    %84 = tpu.matmul %82, %83, %cst_48 {dimension_numbers = #tpu.dot_dimension_numbers<[1], [0], [0], [1], [0, 0, 1, 1], [], []>} : vector<16x32xf32>, vector<32x32xf32>, vector<16x32xf32> -> vector<16x32xf32>
    %c0_49 = arith.constant 0 : index
    %c0_50 = arith.constant 0 : index
    %85 = vector.load %arg8[%c0_49, %c0_50] : memref<1x32xf32, #tpu.memory_space<vmem>>, vector<1x32xf32>
    %86 = vector.broadcast %85 : vector<1x32xf32> to vector<16x32xf32>
    %87 = arith.addf %84, %86 : vector<16x32xf32>
    %88 = arith.addf %87, %24 : vector<16x32xf32>
    %89 = vector.shape_cast %88 : vector<16x32xf32> to vector<2x8x32xf32>
    %cst_51 = arith.constant dense<0.000000e+00> : vector<2x8xf32>
    %90 = vector.multi_reduction <add>, %89, %cst_51 [2] : vector<2x8x32xf32> to vector<2x8xf32>
    %91 = vector.shape_cast %90 : vector<2x8xf32> to vector<2x8x1xf32>
    %cst_52 = arith.constant 3.200000e+01 : f32
    %92 = vector.broadcast %cst_52 : f32 to vector<2x8x1xf32>
    %93 = arith.divf %91, %92 : vector<2x8x1xf32>
    %94 = vector.broadcast %93 : vector<2x8x1xf32> to vector<2x8x32xf32>
    %95 = arith.subf %89, %94 : vector<2x8x32xf32>
    %96 = arith.mulf %95, %95 : vector<2x8x32xf32>
    %cst_53 = arith.constant dense<0.000000e+00> : vector<2x8xf32>
    %97 = vector.multi_reduction <add>, %96, %cst_53 [2] : vector<2x8x32xf32> to vector<2x8xf32>
    %98 = vector.shape_cast %97 : vector<2x8xf32> to vector<2x8x1xf32>
    %cst_54 = arith.constant 3.200000e+01 : f32
    %99 = vector.broadcast %cst_54 : f32 to vector<2x8x1xf32>
    %100 = arith.divf %98, %99 : vector<2x8x1xf32>
    %101 = vector.broadcast %93 : vector<2x8x1xf32> to vector<2x8x32xf32>
    %102 = arith.subf %89, %101 : vector<2x8x32xf32>
    %cst_55 = arith.constant 9.99999974E-6 : f32
    %103 = vector.broadcast %cst_55 : f32 to vector<2x8x1xf32>
    %104 = arith.addf %100, %103 : vector<2x8x1xf32>
    %105 = math.rsqrt %104 : vector<2x8x1xf32>
    %106 = vector.broadcast %105 : vector<2x8x1xf32> to vector<2x8x32xf32>
    %107 = arith.mulf %102, %106 : vector<2x8x32xf32>
    %108 = vector.shape_cast %8 : vector<2x32xf32> to vector<2x1x32xf32>
    %109 = vector.broadcast %108 : vector<2x1x32xf32> to vector<2x8x32xf32>
    %110 = arith.mulf %107, %109 : vector<2x8x32xf32>
    %111 = vector.shape_cast %13 : vector<2x32xf32> to vector<2x1x32xf32>
    %112 = vector.broadcast %111 : vector<2x1x32xf32> to vector<2x8x32xf32>
    %113 = arith.addf %110, %112 : vector<2x8x32xf32>
    %114 = vector.broadcast %2 : vector<2x8x1xf32> to vector<2x8x32xf32>
    %115 = arith.mulf %113, %114 : vector<2x8x32xf32>
    %cst_56 = arith.constant 0.000000e+00 : f32
    %116 = vector.broadcast %cst_56 : f32 to vector<2x4x32xf32>
    %117 = tpu.concatenate %116, %115, %116 in 1 : vector<2x4x32xf32>, vector<2x8x32xf32>, vector<2x4x32xf32> -> vector<2x16x32xf32>
    %118 = vector.extract_strided_slice %117 {offsets = [0, 0, 0], sizes = [2, 8, 32], strides = [1, 1, 1]} : vector<2x16x32xf32> to vector<2x8x32xf32>
    %119 = vector.extract_strided_slice %117 {offsets = [0, 1, 0], sizes = [2, 8, 32], strides = [1, 1, 1]} : vector<2x16x32xf32> to vector<2x8x32xf32>
    %120 = vector.extract_strided_slice %117 {offsets = [0, 2, 0], sizes = [2, 8, 32], strides = [1, 1, 1]} : vector<2x16x32xf32> to vector<2x8x32xf32>
    %121 = vector.extract_strided_slice %117 {offsets = [0, 3, 0], sizes = [2, 8, 32], strides = [1, 1, 1]} : vector<2x16x32xf32> to vector<2x8x32xf32>
    %122 = vector.extract_strided_slice %117 {offsets = [0, 4, 0], sizes = [2, 8, 32], strides = [1, 1, 1]} : vector<2x16x32xf32> to vector<2x8x32xf32>
    %123 = vector.extract_strided_slice %117 {offsets = [0, 5, 0], sizes = [2, 8, 32], strides = [1, 1, 1]} : vector<2x16x32xf32> to vector<2x8x32xf32>
    %124 = vector.extract_strided_slice %117 {offsets = [0, 6, 0], sizes = [2, 8, 32], strides = [1, 1, 1]} : vector<2x16x32xf32> to vector<2x8x32xf32>
    %125 = vector.extract_strided_slice %117 {offsets = [0, 7, 0], sizes = [2, 8, 32], strides = [1, 1, 1]} : vector<2x16x32xf32> to vector<2x8x32xf32>
    %126 = vector.extract_strided_slice %117 {offsets = [0, 8, 0], sizes = [2, 8, 32], strides = [1, 1, 1]} : vector<2x16x32xf32> to vector<2x8x32xf32>
    %127 = tpu.concatenate %118, %119, %120, %121, %122, %123, %124, %125, %126 in 2 : vector<2x8x32xf32>, vector<2x8x32xf32>, vector<2x8x32xf32>, vector<2x8x32xf32>, vector<2x8x32xf32>, vector<2x8x32xf32>, vector<2x8x32xf32>, vector<2x8x32xf32>, vector<2x8x32xf32> -> vector<2x8x288xf32>
    %128 = vector.shape_cast %127 : vector<2x8x288xf32> to vector<16x288xf32>
    %c0_57 = arith.constant 0 : index
    %c0_58 = arith.constant 0 : index
    %c0_59 = arith.constant 0 : index
    %129 = vector.load %arg9[%c0_57, %c0_58, %c0_59] : memref<9x32x64xf32, #tpu.memory_space<vmem>>, vector<9x32x64xf32>
    %130 = vector.shape_cast %129 : vector<9x32x64xf32> to vector<288x64xf32>
    %cst_60 = arith.constant dense<0.000000e+00> : vector<16x64xf32>
    %131 = tpu.matmul %128, %130, %cst_60 {dimension_numbers = #tpu.dot_dimension_numbers<[1], [0], [0], [1], [0, 0, 1, 1], [], []>} : vector<16x288xf32>, vector<288x64xf32>, vector<16x64xf32> -> vector<16x64xf32>
    %c0_61 = arith.constant 0 : index
    %c0_62 = arith.constant 0 : index
    %132 = vector.load %arg10[%c0_61, %c0_62] : memref<1x64xf32, #tpu.memory_space<vmem>>, vector<1x64xf32>
    %133 = vector.broadcast %132 : vector<1x64xf32> to vector<16x64xf32>
    %134 = arith.addf %131, %133 : vector<16x64xf32>
    %cst_63 = arith.constant 0.000000e+00 : f32
    %135 = vector.broadcast %cst_63 : f32 to vector<16x64xf32>
    %136 = arith.maximumf %134, %135 : vector<16x64xf32>
    %137 = vector.shape_cast %136 : vector<16x64xf32> to vector<2x8x64xf32>
    %138 = vector.shape_cast %137 : vector<2x8x64xf32> to vector<16x64xf32>
    %c0_64 = arith.constant 0 : index
    %c0_65 = arith.constant 0 : index
    %c0_66 = arith.constant 0 : index
    %139 = vector.load %arg11[%c0_64, %c0_65, %c0_66] : memref<1x64x32xf32, #tpu.memory_space<vmem>>, vector<1x64x32xf32>
    %140 = vector.shape_cast %139 : vector<1x64x32xf32> to vector<64x32xf32>
    %cst_67 = arith.constant dense<0.000000e+00> : vector<16x32xf32>
    %141 = tpu.matmul %138, %140, %cst_67 {dimension_numbers = #tpu.dot_dimension_numbers<[1], [0], [0], [1], [0, 0, 1, 1], [], []>} : vector<16x64xf32>, vector<64x32xf32>, vector<16x32xf32> -> vector<16x32xf32>
    %c0_68 = arith.constant 0 : index
    %c0_69 = arith.constant 0 : index
    %142 = vector.load %arg12[%c0_68, %c0_69] : memref<1x32xf32, #tpu.memory_space<vmem>>, vector<1x32xf32>
    %143 = vector.broadcast %142 : vector<1x32xf32> to vector<16x32xf32>
    %144 = arith.addf %141, %143 : vector<16x32xf32>
    %145 = vector.shape_cast %115 : vector<2x8x32xf32> to vector<16x32xf32>
    %146 = arith.addf %144, %145 : vector<16x32xf32>
    %147 = vector.shape_cast %146 : vector<16x32xf32> to vector<2x8x32xf32>
    %cst_70 = arith.constant dense<0.000000e+00> : vector<2x8xf32>
    %148 = vector.multi_reduction <add>, %147, %cst_70 [2] : vector<2x8x32xf32> to vector<2x8xf32>
    %149 = vector.shape_cast %148 : vector<2x8xf32> to vector<2x8x1xf32>
    %cst_71 = arith.constant 3.200000e+01 : f32
    %150 = vector.broadcast %cst_71 : f32 to vector<2x8x1xf32>
    %151 = arith.divf %149, %150 : vector<2x8x1xf32>
    %152 = vector.broadcast %151 : vector<2x8x1xf32> to vector<2x8x32xf32>
    %153 = arith.subf %147, %152 : vector<2x8x32xf32>
    %154 = arith.mulf %153, %153 : vector<2x8x32xf32>
    %cst_72 = arith.constant dense<0.000000e+00> : vector<2x8xf32>
    %155 = vector.multi_reduction <add>, %154, %cst_72 [2] : vector<2x8x32xf32> to vector<2x8xf32>
    %156 = vector.shape_cast %155 : vector<2x8xf32> to vector<2x8x1xf32>
    %cst_73 = arith.constant 3.200000e+01 : f32
    %157 = vector.broadcast %cst_73 : f32 to vector<2x8x1xf32>
    %158 = arith.divf %156, %157 : vector<2x8x1xf32>
    %159 = vector.broadcast %151 : vector<2x8x1xf32> to vector<2x8x32xf32>
    %160 = arith.subf %147, %159 : vector<2x8x32xf32>
    %cst_74 = arith.constant 9.99999974E-6 : f32
    %161 = vector.broadcast %cst_74 : f32 to vector<2x8x1xf32>
    %162 = arith.addf %158, %161 : vector<2x8x1xf32>
    %163 = math.rsqrt %162 : vector<2x8x1xf32>
    %164 = vector.broadcast %163 : vector<2x8x1xf32> to vector<2x8x32xf32>
    %165 = arith.mulf %160, %164 : vector<2x8x32xf32>
    %166 = vector.shape_cast %18 : vector<2x32xf32> to vector<2x1x32xf32>
    %167 = vector.broadcast %166 : vector<2x1x32xf32> to vector<2x8x32xf32>
    %168 = arith.mulf %165, %167 : vector<2x8x32xf32>
    %169 = vector.shape_cast %23 : vector<2x32xf32> to vector<2x1x32xf32>
    %170 = vector.broadcast %169 : vector<2x1x32xf32> to vector<2x8x32xf32>
    %171 = arith.addf %168, %170 : vector<2x8x32xf32>
    %172 = vector.broadcast %2 : vector<2x8x1xf32> to vector<2x8x32xf32>
    %173 = arith.mulf %171, %172 : vector<2x8x32xf32>
    %c0_75 = arith.constant 0 : index
    %c0_76 = arith.constant 0 : index
    %c0_77 = arith.constant 0 : index
    %174 = vector.load %arg21[%c0_75, %c0_76, %c0_77] : memref<2x8x32xf32, #tpu.memory_space<vmem>>, vector<2x8x32xf32>
    tpu.vector_store %arg21[%c0_75, %c0_76, %c0_77], %173 {strides = array<i32>} : memref<2x8x32xf32, #tpu.memory_space<vmem>>, vector<2x8x32xf32>,
    return
  }
  func.func @transform_0(%arg0: i32) -> (i32, i32, i32) {
    %c0_i32 = arith.constant 0 : i32
    %c0_i32_0 = arith.constant 0 : i32
    %c0_i32_1 = arith.constant 0 : i32
    %c0_i32_2 = arith.constant 0 : i32
    return %c0_i32, %c0_i32_0, %c0_i32_1 : i32, i32, i32
  }
  func.func @transform_1(%arg0: i32) -> (i32, i32) {
    %c0_i32 = arith.constant 0 : i32
    %c0_i32_0 = arith.constant 0 : i32
    %c0_i32_1 = arith.constant 0 : i32
    return %c0_i32, %c0_i32_0 : i32, i32
  }
  func.func @transform_2(%arg0: i32) -> (i32, i32, i32) {
    %c0_i32 = arith.constant 0 : i32
    %c0_i32_0 = arith.constant 0 : i32
    %c0_i32_1 = arith.constant 0 : i32
    %c0_i32_2 = arith.constant 0 : i32
    return %c0_i32, %c0_i32_0, %c0_i32_1 : i32, i32, i32
  }
  func.func @transform_3(%arg0: i32) -> (i32, i32) {
    %c0_i32 = arith.constant 0 : i32
    %c0_i32_0 = arith.constant 0 : i32
    %c0_i32_1 = arith.constant 0 : i32
    return %c0_i32, %c0_i32_0 : i32, i32
  }
  func.func @transform_4(%arg0: i32) -> (i32, i32) {
    %c0_i32 = arith.constant 0 : i32
    %c0_i32_0 = arith.constant 0 : i32
    %c0_i32_1 = arith.constant 0 : i32
    return %c0_i32, %c0_i32_0 : i32, i32
  }
  func.func @transform_5(%arg0: i32) -> (i32, i32) {
    %c0_i32 = arith.constant 0 : i32
    %c0_i32_0 = arith.constant 0 : i32
    %c0_i32_1 = arith.constant 0 : i32
    return %c0_i32, %c0_i32_0 : i32, i32
  }
  func.func @transform_6(%arg0: i32) -> (i32, i32) {
    %c0_i32 = arith.constant 0 : i32
    %c0_i32_0 = arith.constant 0 : i32
    %c0_i32_1 = arith.constant 0 : i32
    return %c0_i32, %c0_i32_0 : i32, i32
  }
  func.func @transform_7(%arg0: i32) -> (i32, i32) {
    %c0_i32 = arith.constant 0 : i32
    %c0_i32_0 = arith.constant 0 : i32
    %c0_i32_1 = arith.constant 0 : i32
    return %c0_i32, %c0_i32_0 : i32, i32
  }
  func.func @transform_8(%arg0: i32) -> (i32, i32, i32) {
    %c0_i32 = arith.constant 0 : i32
    %c0_i32_0 = arith.constant 0 : i32
    %c0_i32_1 = arith.constant 0 : i32
    %c0_i32_2 = arith.constant 0 : i32
    return %c0_i32, %c0_i32_0, %c0_i32_1 : i32, i32, i32
  }
  func.func @transform_9(%arg0: i32) -> (i32, i32) {
    %c0_i32 = arith.constant 0 : i32
    %c0_i32_0 = arith.constant 0 : i32
    %c0_i32_1 = arith.constant 0 : i32
    return %c0_i32, %c0_i32_0 : i32, i32
  }
  func.func @transform_10(%arg0: i32) -> (i32, i32, i32) {
    %c0_i32 = arith.constant 0 : i32
    %c0_i32_0 = arith.constant 0 : i32
    %c0_i32_1 = arith.constant 0 : i32
    %c0_i32_2 = arith.constant 0 : i32
    return %c0_i32, %c0_i32_0, %c0_i32_1 : i32, i32, i32
  }
  func.func @transform_11(%arg0: i32) -> (i32, i32) {
    %c0_i32 = arith.constant 0 : i32
    %c0_i32_0 = arith.constant 0 : i32
    %c0_i32_1 = arith.constant 0 : i32
    return %c0_i32, %c0_i32_0 : i32, i32
  }
  func.func @transform_12(%arg0: i32) -> (i32, i32) {
    %c0_i32 = arith.constant 0 : i32
    %c0_i32_0 = arith.constant 0 : i32
    %c0_i32_1 = arith.constant 0 : i32
    return %c0_i32, %c0_i32_0 : i32, i32
  }
  func.func @transform_13(%arg0: i32) -> (i32, i32) {
    %c0_i32 = arith.constant 0 : i32
    %c0_i32_0 = arith.constant 0 : i32
    %c0_i32_1 = arith.constant 0 : i32
    return %c0_i32, %c0_i32_0 : i32, i32
  }
  func.func @transform_14(%arg0: i32) -> (i32, i32) {
    %c0_i32 = arith.constant 0 : i32
    %c0_i32_0 = arith.constant 0 : i32
    %c0_i32_1 = arith.constant 0 : i32
    return %c0_i32, %c0_i32_0 : i32, i32
  }
  func.func @transform_15(%arg0: i32) -> (i32, i32) {
    %c0_i32 = arith.constant 0 : i32
    %c0_i32_0 = arith.constant 0 : i32
    %c0_i32_1 = arith.constant 0 : i32
    return %c0_i32, %c0_i32_0 : i32, i32
  }
  func.func @transform_16(%arg0: i32) -> (i32, i32) {
    %c0_i32 = arith.constant 0 : i32
    %c0_i32_0 = arith.constant 0 : i32
    %c0_i32_1 = arith.constant 0 : i32
    return %c0_i32, %c0_i32_0 : i32, i32
  }
  func.func @transform_17(%arg0: i32) -> (i32, i32) {
    %c0_i32 = arith.constant 0 : i32
    %c0_i32_0 = arith.constant 0 : i32
    %c0_i32_1 = arith.constant 0 : i32
    return %c0_i32, %c0_i32_0 : i32, i32
  }
  func.func @transform_18(%arg0: i32) -> (i32, i32) {
    %c0_i32 = arith.constant 0 : i32
    %c0_i32_0 = arith.constant 0 : i32
    %c0_i32_1 = arith.constant 0 : i32
    return %c0_i32, %c0_i32_0 : i32, i32
  }
  func.func @transform_19(%arg0: i32) -> (i32, i32) {
    %c0_i32 = arith.constant 0 : i32
    %c0_i32_0 = arith.constant 0 : i32
    %c0_i32_1 = arith.constant 0 : i32
    return %c0_i32, %c0_i32_0 : i32, i32
  }
  func.func @transform_20(%arg0: i32) -> (i32, i32, i32) {
    %c0_i32 = arith.constant 0 : i32
    %c0_i32_0 = arith.constant 0 : i32
    %c0_i32_1 = arith.constant 0 : i32
    %c0_i32_2 = arith.constant 0 : i32
    return %c0_i32, %c0_i32_0, %c0_i32_1 : i32, i32, i32
  }
}

</mosaic_0001>

<bundles_post_ra>
// kernel: tpu_custom_call.1
= control target key start
LH: loop header
LB: loop body
LE: loop exit
PB: predicated region body
PF: predicated region fallthrough
CT: control target
= control target key end

     0   :  { %s3368_s0 = inlined_call_operand.hbm [shape: f32[2,8,32], index: 0, kind: input, shape index: {}]   ;;  %s3369_s1 = inlined_call_operand.vmem [shape: f32[2,8], index: 1, kind: input, shape index: {}]   ;;  %s3370_s2 = inlined_call_operand.vmem [shape: f32[2,8,1], index: 2, kind: input, shape index: {}]   ;;  %s3371_s3 = inlined_call_operand.hbm [shape: f32[2,32], index: 3, kind: input, shape index: {}]   ;;  %s3372_s4 = inlined_call_operand.vmem [shape: f32[32,96], index: 4, kind: input, shape index: {}]   ;;  %s3373_s5 = inlined_call_operand.vmem [shape: f32[1,96], index: 5, kind: input, shape index: {}]   ;;  %s3374_s6 = inlined_call_operand.vmem [shape: f32[32,32], index: 6, kind: input, shape index: {}]   ;;  %s3375_s7 = inlined_call_operand.hbm [shape: f32[1,32], index: 7, kind: input, shape index: {}]   ;;  %s3376_s8 = inlined_call_operand.hbm [shape: f32[9,32,64], index: 8, kind: input, shape index: {}]   ;;  %s3377_s9 = inlined_call_operand.hbm [shape: f32[1,64], index: 9, kind: input, shape index: {}]   ;;  %s3378_s10 = inlined_call_operand.vmem [shape: f32[1,64,32], index: 10, kind: input, shape index: {}]   ;;  %s3379_s11 = inlined_call_operand.hbm [shape: f32[1,32], index: 11, kind: input, shape index: {}]   ;;  %s3380_s12 = inlined_call_operand.vmem [shape: f32[32,32], index: 12, kind: input, shape index: {}]   ;;  %s3381_s13 = inlined_call_operand.hbm [shape: f32[1,32], index: 13, kind: input, shape index: {}]   ;;  %s3382_s14 = inlined_call_operand.vmem [shape: f32[32,32], index: 14, kind: input, shape index: {}]   ;;  %s3383_s15 = inlined_call_operand.vmem [shape: f32[1,32], index: 15, kind: input, shape index: {}]   ;;  %s3384_s16 = inlined_call_operand.hbm [shape: f32[32,32], index: 16, kind: input, shape index: {}]   ;;  %s3385_s17 = inlined_call_operand.vmem [shape: f32[1,32], index: 17, kind: input, shape index: {}]   ;;  %s3386_s18 = inlined_call_operand.hbm [shape: f32[32,32], index: 18, kind: input, shape index: {}]   ;;  %s3387_s19 = inlined_call_operand.vmem [shape: f32[1,32], index: 19, kind: input, shape index: {}]   ;;  %s3388_s20 = inlined_call_operand.hbm [shape: f32[2,8,32], index: 20, kind: output, shape index: {}]  }
   0x1   :  { %3393 = sst [smem:[#allocation24_spill]] %s3368_s0 }
   0x2   :  { %3394 = sst [smem:[#allocation25_spill]] %s3369_s1 }
   0x3   :  { %3395 = sst [smem:[#allocation26_spill]] %s3370_s2 }
   0x4   :  { %3396 = sst [smem:[#allocation27_spill]] %s3371_s3 }
   0x5   :  { %3397 = sst [smem:[#allocation28_spill]] %s3372_s4 }
   0x6   :  { %25 = vsyncpa [#allocation3], 0 }
   0x7   :  { %26 = vsyncpa [#allocation6], 0 }
   0x8   :  { %27 = vsyncpa [#allocation9], 0 }
   0x9   :  { %28 = vsyncpa [#allocation12], 0 }
   0xa   :  { %29 = vsyncpa [#allocation15], 0 }
   0xb   :  { %30 = vsyncpa [#allocation4], 0  ;;  %s2738_s1 = smov [#allocation5]   ;;  %s3398_s2 = sld [smem:[#allocation27_spill]] }
   0xc   :  { %s53_s22 = sshll.u32 %s2738_s1, 4  ;;  %s54_s22 = int_to_ptr.vmem [resolvable:$true] %s53_s22 }
  0x11   :  { %s2506_s25 = scalar_lea.hbm %s3398_s2, 32 }
  0x12   :  { %p2507_p0 = scmp.ne.s32.totalorder %s3398_s2, %s2506_s25  ;;  %p2510_p1 = scmp.lt.u32.totalorder %s2506_s25, %s3398_s2 }
  0x14   :  { %p2512_p2 = pnand %p2510_p1, %p2507_p0 }
  0x16   :  { %2515 = shalt.err (!%p2512_p2)
}
  0x17   :  { %s2516_s4 = scalar_lea.vmem %s54_s22, 32  ;;  %p2521_p4 = scmp.lt.s32.totalorder %s54_s22, %s54_s22 }
  0x18   :  { %p2517_p3 = scmp.ne.s32.totalorder %s54_s22, %s2516_s4  ;;  %p2522_p5 = scmp.lt.s32.totalorder %s2516_s4, %s2516_s4 }
  0x1a   :  { %p2523_p6 = por %p2522_p5, %p2521_p4 }
  0x1c   :  { %p2524_p7 = pnand %p2523_p6, %p2517_p3 }
  0x1e   :  { %2527 = shalt.err (!%p2524_p7)
}
  0x1f   :  { %56 = dma.hbm_to_vmem [thread:$0]  %s3398_s2, 32, %s54_s22, [#allocation6]  }
  0x20   :  { %s2739_s0 = smov [#allocation8]   ;;  %s2740_s1 = smov [#allocation11]  }
  0x21   :  { %s78_s21 = sshll.u32 %s2739_s0, 4  ;;  %s103_s23 = sshll.u32 %s2740_s1, 4  ;;  %s79_s21 = int_to_ptr.vmem [resolvable:$true] %s78_s21  ;;  %s104_s23 = int_to_ptr.vmem [resolvable:$true] %s103_s23 }
  0x22   :  { %s2528_s3 = scalar_lea.hbm %s3376_s8, 4608 }
  0x23   :  { %p2529_p8 = scmp.ne.s32.totalorder %s3376_s8, %s2528_s3  ;;  %p2532_p9 = scmp.lt.u32.totalorder %s2528_s3, %s3376_s8 }
  0x25   :  { %p2534_p10 = pnand %p2532_p9, %p2529_p8 }
  0x27   :  { %2537 = shalt.err (!%p2534_p10)
}
  0x28   :  { %s2538_s22 = scalar_lea.vmem %s79_s21, 4608  ;;  %p2543_p12 = scmp.lt.s32.totalorder %s79_s21, %s79_s21 }
  0x29   :  { %p2539_p11 = scmp.ne.s32.totalorder %s79_s21, %s2538_s22  ;;  %p2544_p13 = scmp.lt.s32.totalorder %s2538_s22, %s2538_s22 }
  0x2b   :  { %p2545_p0 = por %p2544_p13, %p2543_p12 }
  0x2d   :  { %p2546_p1 = pnand %p2545_p0, %p2539_p11 }
  0x2f   :  { %2549 = shalt.err (!%p2546_p1)
}
  0x30   :  { %s2741_s2 = smov 128   ;;  %s2742_s29 = smov 8  }
  0x31   :  { %84 = dma.hbm_to_vmem [thread:$0]  %s3376_s8, 4608, %s79_s21, [#allocation9], %s2741_s2, %s2741_s2, %s2742_s29  }
  0x32   :  { %s2550_s25 = scalar_lea.hbm %s3379_s11, 16 }
  0x33   :  { %p2551_p2 = scmp.ne.s32.totalorder %s3379_s11, %s2550_s25  ;;  %p2554_p3 = scmp.lt.u32.totalorder %s2550_s25, %s3379_s11 }
  0x35   :  { %p2556_p4 = pnand %p2554_p3, %p2551_p2 }
  0x37   :  { %2559 = shalt.err (!%p2556_p4)
}
  0x38   :  { %s2560_s4 = scalar_lea.vmem %s104_s23, 16  ;;  %s2564_s22 = scalar_lea.vmem %s104_s23, 32 }
  0x39   :  { %p2561_p5 = scmp.ne.s32.totalorder %s104_s23, %s2560_s4  ;;  %p2565_p6 = scmp.lt.s32.totalorder %s104_s23, %s104_s23 }
  0x3a   :  { %p2566_p7 = scmp.lt.s32.totalorder %s2564_s22, %s2560_s4 }
  0x3c   :  { %p2567_p8 = por %p2566_p7, %p2565_p6 }
  0x3e   :  { %p2568_p9 = pnand %p2567_p8, %p2561_p5 }
  0x40   :  { %2571 = shalt.err (!%p2568_p9)
}
  0x41   :  { %106 = dma.hbm_to_vmem [thread:$0]  %s3379_s11, 16, %s104_s23, [#allocation12]  }
  0x42   :  { %s2743_s30 = smov [#allocation14]   ;;  %s2744_s1 = smov [#allocation2]  }
  0x43   :  { %s128_s0 = sshll.u32 %s2743_s30, 4  ;;  %s36_s24 = sshll.u32 %s2744_s1, 4  ;;  %s129_s0 = int_to_ptr.vmem [resolvable:$true] %s128_s0  ;;  %s37_s24 = int_to_ptr.vmem [resolvable:$true] %s36_s24 }
  0x44   :  { %s2572_s26 = scalar_lea.hbm %s3384_s16, 512 }
  0x45   :  { %p2573_p10 = scmp.ne.s32.totalorder %s3384_s16, %s2572_s26  ;;  %p2576_p11 = scmp.lt.u32.totalorder %s2572_s26, %s3384_s16 }
  0x47   :  { %p2578_p12 = pnand %p2576_p11, %p2573_p10 }
  0x49   :  { %2581 = shalt.err (!%p2578_p12)
}
  0x4a   :  { %s2582_s11 = scalar_lea.vmem %s129_s0, 512  ;;  %p2587_p0 = scmp.lt.s32.totalorder %s129_s0, %s129_s0 }
  0x4b   :  { %p2583_p13 = scmp.ne.s32.totalorder %s129_s0, %s2582_s11  ;;  %p2588_p1 = scmp.lt.s32.totalorder %s2582_s11, %s2582_s11 }
  0x4d   :  { %p2589_p2 = por %p2588_p1, %p2587_p0 }
  0x4f   :  { %p2590_p3 = pnand %p2589_p2, %p2583_p13 }
  0x51   :  { %2593 = shalt.err (!%p2590_p3)
}
  0x52   :  { %134 = dma.hbm_to_vmem [thread:$0]  %s3384_s16, 512, %s129_s0, [#allocation15], %s2741_s2, %s2741_s2, %s2742_s29  }
  0x53   :  { %s3399_s1 = sld [smem:[#allocation24_spill]] }
  0x59   :  { %s2594_s25 = scalar_lea.hbm %s3399_s1, 256 }
  0x5a   :  { %p2595_p4 = scmp.ne.s32.totalorder %s3399_s1, %s2594_s25  ;;  %p2598_p5 = scmp.lt.u32.totalorder %s2594_s25, %s3399_s1 }
  0x5c   :  { %p2600_p6 = pnand %p2598_p5, %p2595_p4 }
  0x5e   :  { %2603 = shalt.err (!%p2600_p6)
}
  0x5f   :  { %s2604_s4 = scalar_lea.vmem %s37_s24, 256  ;;  %p2609_p8 = scmp.lt.s32.totalorder %s37_s24, %s37_s24 }
  0x60   :  { %p2605_p7 = scmp.ne.s32.totalorder %s37_s24, %s2604_s4  ;;  %p2610_p9 = scmp.lt.s32.totalorder %s2604_s4, %s2604_s4 }
  0x62   :  { %p2611_p10 = por %p2610_p9, %p2609_p8 }
  0x64   :  { %p2612_p11 = pnand %p2611_p10, %p2605_p7 }
  0x66   :  { %2615 = shalt.err (!%p2612_p11)
}
  0x67   :  { %42 = dma.hbm_to_vmem [thread:$0]  %s3399_s1, 256, %s37_s24, [#allocation3], %s2741_s2, %s2741_s2, %s2742_s29  }
  0x68   :  { %s2745_s22 = smov [#allocation7]   ;;  %s2746_s23 = smov [#allocation10]  }
  0x69   :  { %s69_s11 = sshll.u32 %s2745_s22, 4  ;;  %s91_s8 = sshll.u32 %s2746_s23, 4  ;;  %s70_s11 = int_to_ptr.vmem [resolvable:$true] %s69_s11  ;;  %s92_s8 = int_to_ptr.vmem [resolvable:$true] %s91_s8 }
  0x6a   :  { %s2616_s25 = scalar_lea.hbm %s3375_s7, 16 }
  0x6b   :  { %p2617_p12 = scmp.ne.s32.totalorder %s3375_s7, %s2616_s25  ;;  %p2620_p13 = scmp.lt.u32.totalorder %s2616_s25, %s3375_s7 }
  0x6d   :  { %p2622_p0 = pnand %p2620_p13, %p2617_p12 }
  0x6f   :  { %2625 = shalt.err (!%p2622_p0)
}
  0x70   :  { %s2626_s24 = scalar_lea.vmem %s70_s11, 16  ;;  %s2630_s1 = scalar_lea.vmem %s70_s11, 32 }
  0x71   :  { %p2627_p1 = scmp.ne.s32.totalorder %s70_s11, %s2626_s24  ;;  %p2631_p2 = scmp.lt.s32.totalorder %s70_s11, %s70_s11 }
  0x72   :  { %p2632_p3 = scmp.lt.s32.totalorder %s2630_s1, %s2626_s24 }
  0x74   :  { %p2633_p4 = por %p2632_p3, %p2631_p2 }
  0x76   :  { %p2634_p5 = pnand %p2633_p4, %p2627_p1 }
  0x78   :  { %2637 = shalt.err (!%p2634_p5)
}
  0x79   :  { %72 = dma.hbm_to_vmem [thread:$0]  %s3375_s7, 16, %s70_s11, [#allocation6]  }
  0x7a   :  { %s2638_s23 = scalar_lea.hbm %s3377_s9, 16 }
  0x7b   :  { %p2639_p6 = scmp.ne.s32.totalorder %s3377_s9, %s2638_s23  ;;  %p2642_p7 = scmp.lt.u32.totalorder %s2638_s23, %s3377_s9 }
  0x7d   :  { %p2644_p8 = pnand %p2642_p7, %p2639_p6 }
  0x7f   :  { %2647 = shalt.err (!%p2644_p8)
}
  0x80   :  { %s2648_s26 = scalar_lea.vmem %s92_s8, 16  ;;  %s2652_s27 = scalar_lea.vmem %s92_s8, 32 }
  0x81   :  { %p2649_p9 = scmp.ne.s32.totalorder %s92_s8, %s2648_s26  ;;  %p2653_p10 = scmp.lt.s32.totalorder %s92_s8, %s92_s8 }
  0x82   :  { %p2654_p11 = scmp.lt.s32.totalorder %s2652_s27, %s2648_s26 }
  0x84   :  { %p2655_p12 = por %p2654_p11, %p2653_p10 }
  0x86   :  { %p2656_p13 = pnand %p2655_p12, %p2649_p9 }
  0x88   :  { %2659 = shalt.err (!%p2656_p13)
}
  0x89   :  { %94 = dma.hbm_to_vmem [thread:$0]  %s3377_s9, 16, %s92_s8, [#allocation9]  }
  0x8a   :  { %s2747_s28 = smov [#allocation13]   ;;  %s2748_s1 = smov [#allocation16]  }
  0x8b   :  { %s115_s24 = sshll.u32 %s2747_s28, 4  ;;  %s142_s4 = sshll.u32 %s2748_s1, 4  ;;  %s116_s24 = int_to_ptr.vmem [resolvable:$true] %s115_s24  ;;  %s143_s4 = int_to_ptr.vmem [resolvable:$true] %s142_s4 }
  0x8c   :  { %s2660_s22 = scalar_lea.hbm %s3381_s13, 16 }
  0x8d   :  { %p2661_p0 = scmp.ne.s32.totalorder %s3381_s13, %s2660_s22  ;;  %p2664_p1 = scmp.lt.u32.totalorder %s2660_s22, %s3381_s13 }
  0x8f   :  { %p2666_p2 = pnand %p2664_p1, %p2661_p0 }
  0x91   :  { %2669 = shalt.err (!%p2666_p2)
}
  0x92   :  { %s2670_s9 = scalar_lea.vmem %s116_s24, 16  ;;  %s2674_s8 = scalar_lea.vmem %s116_s24, 32 }
  0x93   :  { %p2671_p3 = scmp.ne.s32.totalorder %s116_s24, %s2670_s9  ;;  %p2675_p4 = scmp.lt.s32.totalorder %s116_s24, %s116_s24 }
  0x94   :  { %p2676_p5 = scmp.lt.s32.totalorder %s2674_s8, %s2670_s9 }
  0x96   :  { %p2677_p6 = por %p2676_p5, %p2675_p4 }
  0x98   :  { %p2678_p7 = pnand %p2677_p6, %p2671_p3 }
  0x9a   :  { %2681 = shalt.err (!%p2678_p7)
}
  0x9b   :  { %118 = dma.hbm_to_vmem [thread:$0]  %s3381_s13, 16, %s116_s24, [#allocation12]  }
  0x9c   :  { %s2682_s11 = scalar_lea.hbm %s3386_s18, 512 }
  0x9d   :  { %p2683_p8 = scmp.ne.s32.totalorder %s3386_s18, %s2682_s11  ;;  %p2686_p9 = scmp.lt.u32.totalorder %s2682_s11, %s3386_s18 }
  0x9f   :  { %p2688_p10 = pnand %p2686_p9, %p2683_p8 }
  0xa1   :  { %2691 = shalt.err (!%p2688_p10)
}
  0xa2   :  { %s2692_s22 = scalar_lea.vmem %s143_s4, 512  ;;  %p2697_p12 = scmp.lt.s32.totalorder %s143_s4, %s143_s4 }
  0xa3   :  { %p2693_p11 = scmp.ne.s32.totalorder %s143_s4, %s2692_s22  ;;  %p2698_p13 = scmp.lt.s32.totalorder %s2692_s22, %s2692_s22 }
  0xa5   :  { %p2699_p0 = por %p2698_p13, %p2697_p12 }
  0xa7   :  { %p2700_p1 = pnand %p2699_p0, %p2693_p11 }
  0xa9   :  { %2703 = shalt.err (!%p2700_p1)
}
  0xaa   :  { %148 = dma.hbm_to_vmem [thread:$0]  %s3386_s18, 512, %s143_s4, [#allocation15], %s2741_s2, %s2741_s2, %s2742_s29  }
  0xab   :  { %2726 = dma.done.wait [#allocation3], 256  }
  0xac   :  { %2727 = vsyncadd [#allocation3], 4294967040 }
  0xad   :  { %2728 = dma.done.wait [#allocation6], 48  }
  0xae   :  { %2729 = vsyncadd [#allocation6], 4294967248 }
  0xaf   :  { %2730 = dma.done.wait [#allocation9], 4624  }
  0xb0   :  { %2731 = vsyncadd [#allocation9], 4294962672 }
  0xb1   :  { %2732 = dma.done.wait [#allocation12], 32  }
  0xb2   :  { %2733 = vsyncadd [#allocation12], 4294967264 }
  0xb3   :  { %2734 = dma.done.wait [#allocation15], 1024  }
  0xb4   :  { %2735 = vsyncadd [#allocation15], 4294966272  ;;  %v2749_v0 = vmov 0.0|0.0   ;;  %vm2750_vm0 = vmmov 0   ;;  %v2751_v1 = vmov 0.0   ;;  %v184_v2 = vld [vmem:[%s3380_s12] sm:$0xff]  ;;  %v616_v52 = vlaneseq }
  0xb5   :  { %2330 = vmatprep.subr.bf16.mxu0 %v2749_v0  ;;  %2202 = vmatprep.mubr.msk.f32.mxu0 %vm2750_vm0, %v2751_v1  ;;  %v185_v3 = vld [vmem:[%s3380_s12 + $0x8] sm:$0xff]  ;;  %v186_v4 = vld [vmem:[%s3380_s12 + $0x10] sm:$0xff]  ;;  %v187_v6 = vld [vmem:[%s3380_s12 + $0x18] sm:$0xff]  ;;  %vm195_vm1 = vcmask 261120   ;;  %s3400_s27 = sld [smem:[#allocation28_spill]]  ;;  %s2752_s25 = smov 96  }
  0xb6   :  { %2336 = vmatprep.subr.bf16.mxu1 %v2749_v0  ;;  %2213 = vmatprep.mubr.msk.f32.mxu1 %vm2750_vm0, %v2751_v1  ;;  %v2331_v5 = vpack.c.bf16 %v185_v3, %v184_v2  ;;  %v2334_v7 = vpack.c.bf16 %v187_v6, %v186_v4  ;;  %v350_v8 = vld [vmem:[#allocation14] sm:$0xff]  ;;  %v351_v9 = vld [vmem:[#allocation14 + $0x8] sm:$0xff]  ;;  %v183_v10 = vld [vmem:[#allocation5] sm:$0x3]  ;;  %vm636_vm2 = vcmask 130048   ;;  %v617_v54 = vshrl.u32 %v616_v52, 7 }
  0xb7   :  { %v2343_v11 = vpack.c.bf16 %v351_v9, %v350_v8  ;;  %v352_v12 = vld [vmem:[#allocation14 + $0x10] sm:$0xff]  ;;  %v353_v13 = vld [vmem:[#allocation14 + $0x18] sm:$0xff]  ;;  %v3023_v21 = vld [vmem:[#allocation2] sm:$0xff]  ;;  %v2753_v50 = vmov 1966171168   ;;  %s3401_s8 = sld [smem:[#allocation25_spill]] }
  0xb8   :  { %2332 = vmatpush3.bf16.msra.mxu0 %v2331_v5  ;;  %v2346_v16 = vpack.c.bf16 %v353_v13, %v352_v12  ;;  %v3028_v22 = vld [vmem:[#allocation2 + $0x8] sm:$0xff]  ;;  %v269_v23 = vld [vmem:[%s3382_s14] sm:$0xff]  ;;  %v271_v25 = vld [vmem:[%s3382_s14 + $0x10] sm:$0xff]  ;;  %v614_v51 = vunpack.c.l.s4 %v2753_v50  ;;  %v3096_v61 = vsub.s32 0, %v617_v54  ;;  %vm804_vm5 = vcmask 64512   ;;  %s2754_s3 = smov 64  }
  0xb9   :  { %2333 = vmatprep.subr.bf16.mxu0 %v2749_v0  ;;  %v270_v24 = vld [vmem:[%s3382_s14 + $0x8] sm:$0xff]  ;;  %v272_v27 = vld [vmem:[%s3382_s14 + $0x18] sm:$0xff]  ;;  %v2067_v39 = vld [vmem:[%s3373_s5] ss:$0 sm:$0xff]  ;;  %s2755_s26 = smov 80   ;;  %s2757_s7 = smov 48  }
  0xba   :  { %v2337_v26 = vpack.c.bf16 %v270_v24, %v269_v23  ;;  %v2340_v28 = vpack.c.bf16 %v272_v27, %v271_v25  ;;  %v431_v29 = vld [vmem:[#allocation16] sm:$0xff]  ;;  %v432_v30 = vld [vmem:[#allocation16 + $0x8] sm:$0xff]  ;;  %v433_v32 = vld [vmem:[#allocation16 + $0x10] sm:$0xff]  ;;  %v615_v53 = vunpack.c.0.s8 %v614_v51  ;;  %s2758_s24 = smov 16   ;;  %s3402_s4 = sld [smem:[#allocation26_spill]]  ;;  %vm1532_vm6 = vcmask 1043456  }
  0xbb   :  { %v512_v14 = vld [vmem:[%s3400_s27] sm:$0xff]  ;;  %v513_v15 = vld [vmem:[%s3400_s27 + $0x8] sm:$0xff]  ;;  %v514_v18 = vld [vmem:[%s3400_s27 + $0x10] sm:$0xff]  ;;  %v2349_v31 = vpack.c.bf16 %v432_v30, %v431_v29  ;;  %vm1541_vm7 = vcmask 1046528   ;;  %vm1588_vm8 = vcmask 1042432   ;;  %vm1554_vm9 = vcmask 1045504  }
  0xbc   :  { %2335 = vmatpush3.bf16.msra.mxu0 %v2334_v7  ;;  %v2354_v17 = vpack.c.bf16 %v513_v15, %v512_v14  ;;  %v515_v19 = vld [vmem:[%s3400_s27 + $0x18] sm:$0xff]  ;;  %2338 = vmatpush3.bf16.msra.mxu1 %v2337_v26  ;;  %v3091_v56 = vsub.s32 %v615_v53, %v617_v54  ;;  %s2756_s27 = smov 112   ;;  %vm1601_vm10 = vcmask 1041408   ;;  %vm1567_vm11 = vcmask 1044480  }
  0xbd   :  { %2342 = vmatprep.subr.bf16.mxu0 %v2749_v0  ;;  %v2358_v20 = vpack.c.bf16 %v515_v19, %v514_v18  ;;  %2339 = vmatprep.subr.bf16.mxu1 %v2749_v0  ;;  %v434_v33 = vld [vmem:[#allocation16 + $0x18] sm:$0xff]  ;;  %v2070_v55 = vld.sshfl [vmem:[%s3401_s8] sm:$0x11 pattern:$0x75316420]  ;;  %vm1614_vm12 = vcmask 1040384  }
  0xbe   :  { %v2352_v34 = vpack.c.bf16 %v434_v33, %v433_v32  ;;  %v612_v57 = vcombine.high %v2070_v55, %v2070_v55  ;;  %v619_v58 = vrot.slane %v2070_v55, %v3091_v56  ;;  %vm1629_vm13 = vcmask 523264  }
  0xbf   :  { %2203 = vmatmul.mubr.msk.f32.vlgmr.msra.gmra.mrb[0].mxu0 %vm195_vm1, %v183_v10  ;;  %vm1632_vm14 = vcmask 785408  }
  0xc0   :  { %2344 = vmatpush3.bf16.msra.mxu0 %v2343_v11  ;;  %2224 = vmatprep.mubr.msk.f32.mxu0 %vm2750_vm0, %v2751_v1  ;;  %vm629_vm3 = vcmp.gt.f32.partialorder %v619_v58, 0.5  ;;  %v626_v59 = vrot.slane %v612_v57, %v3091_v56 }
  0xc1   :  { %2345 = vmatprep.subr.bf16.mxu0 %v2749_v0  ;;  %2341 = vmatpush3.bf16.msra.mxu1 %v2340_v28  ;;  %v631_v60 = vsel %vm629_vm3, -1e+09, %v2751_v1 }
  0xc2   :  { %2348 = vmatprep.subr.bf16.mxu1 %v2749_v0  ;;  %vm630_vm4 = vcmp.gt.f32.partialorder %v626_v59, 0.5  ;;  %v3099_v62 = vrot.slane %v631_v60, %v3096_v61 }
  0xc4   :  { %2347 = vmatpush3.bf16.msra.mxu0 %v2346_v16  ;;  %2214 = vmatmul.mubr.msk.f32.vlgmr.msra.gmra.mrb[0].mxu1 %vm195_vm1, %v183_v10 }
  0xc5   :  { %2355 = vmatprep.subr.bf16.mxu0 %v2354_v17  ;;  %2350 = vmatpush3.bf16.msra.mxu1 %v2349_v31 }
  0xc6   :  { %2235 = vmatprep.mubr.msk.f32.mxu1 %vm2750_vm0, %v2751_v1  ;;  %2351 = vmatprep.subr.bf16.mxu1 %v2749_v0  ;;  %v632_v0 = vsel %vm630_vm4, -1e+09, %v2751_v1 }
  0xc7   :  { %2225 = vmatmul.mubr.msk.f32.vlgmr.msra.gmra.mrb[2].mxu0 %vm195_vm1, %v183_v10  ;;  %v3104_v5 = vrot.slane %v632_v0, %v3096_v61 }
  0xc8   :  { %2357 = vmatpush3.bf16.msra.mxu0 %v2354_v17  ;;  %2246 = vmatprep.mubr.msk.f32.mxu0 %vm195_vm1, %v3023_v21 }
  0xc9   :  { %2359 = vmatprep.subr.bf16.mxu0 %v2358_v20  ;;  %2353 = vmatpush3.bf16.msra.mxu1 %v2352_v34 }
  0xca   :  { %2249 = vmatprep.subr.mxu1 %v2751_v1 }
  0xcc   :  { %2361 = vmatpush3.bf16.msra.mxu0 %v2358_v20  ;;  %2236 = vmatmul.mubr.msk.f32.vlgmr.msra.gmra.mrb[2].mxu1 %vm195_vm1, %v183_v10 }
  0xcd   :  { %2259 = vmatprep.subr.mxu0 %v2751_v1  ;;  %2251 = vmatprep.mubr.msk.f32.mxu1 %vm2750_vm0, %v2751_v1 }
  0xcf   :  { %2247 = vmatmul.mubr.msk.f32.vlgmr.msra.gmra.mrb[4].mxu0 %vm195_vm1, %v3028_v22 }
  0xd0   :  { %2261 = vmatprep.mubr.msk.f32.mxu0 %vm2750_vm0, %v2751_v1 }
 0x192   :  { %v3057_v35 = vpop.f32.mrb[0].mxu0 }
 0x193   :  { %v2204_v36 = vpop.f32.mrb[1].mxu0 }
 0x197   :  { %v3072_v44 = vpop.f32.mrb[0].mxu1 }
 0x198   :  { %v2215_v45 = vpop.f32.mrb[1].mxu1 }
 0x19a   :  { %v3059_v37 = vpop.f32.mrb[2].mxu0 }
 0x19b   :  { %v2226_v38 = vpop.f32.mrb[3].mxu0 }
 0x19f   :  { %v3074_v46 = vpop.f32.mrb[2].mxu1 }
 0x1a0   :  { %v2237_v47 = vpop.f32.mrb[3].mxu1 }
 0x1a2   :  { %v2248_v40 = vpop.f32.mrb[4].mxu0 }
 0x1a3   :  { %v595_v41 = vpop.f32.mrb[5].mxu0  ;;  %v3068_v43 = vadd.f32 %v2248_v40, %v2067_v39 }
 0x1a4   :  { %v3064_v42 = vadd.f32 %v2067_v39, %v595_v41 }
 0x1a6   :  { %634 = vrot.lane.b32.xlu0 %v3064_v42, %s2752_s25 }
 0x1aa   :  { %712 = vrot.lane.b32.xlu0 %v3068_v43, %s2752_s25 }
 0x218   :  { %v635_v48 = vpop.permute.xlu0 %634 }
 0x219   :  { %2250 = vmatpush3.xpose.msk.msra.mxu1 %vm636_vm2, %v635_v48 }
 0x21a   :  { %2254 = vmatprep.subr.mxu1 %v2751_v1 }
 0x21c   :  { %2252 = vmatmul.mubr.msk.f32.vlgmr.msra.gmra.mrb[4].mxu1 %vm636_vm2, %v3064_v42  ;;  %v713_v49 = vpop.permute.xlu0 %712 }
 0x21d   :  { %2255 = vmatpush3.xpose.msk.msra.mxu1 %vm636_vm2, %v713_v49  ;;  %2256 = vmatprep.mubr.msk.f32.mxu1 %vm2750_vm0, %v2751_v1 }
 0x21e   :  { %2264 = vmatprep.subr.mxu1 %v2751_v1 }
 0x220   :  { %2257 = vmatmul.mubr.msk.f32.vlgmr.msra.gmra.mrb[6].mxu1 %vm636_vm2, %v3068_v43 }
 0x221   :  { %2266 = vmatprep.mubr.msk.f32.mxu1 %vm2750_vm0, %v2751_v1 }
 0x2ef   :  { %v707_v63 = vpop.f32.mrb[4].mxu1 }
 0x2f0   :  { %v788_v2 = vmul.f32 0.25, %v707_v63  ;;  %v2253_v3 = vpop.f32.mrb[5].mxu1 }
 0x2f2   :  { %v802_v4 = vadd.f32 %v3099_v62, %v788_v2 }
 0x2f3   :  { %v784_v6 = vpop.f32.mrb[6].mxu1 }
 0x2f4   :  { %v789_v7 = vmul.f32 0.25, %v784_v6  ;;  %v2258_v8 = vpop.f32.mrb[7].mxu1  ;;  %v805_v9 = vsel %vm804_vm5, %v802_v4, -inf }
 0x2f5   :  { %806 = vmax.xlane.f32.xlu1 %v805_v9 }
 0x2f6   :  { %v803_v10 = vadd.f32 %v3104_v5, %v789_v7 }
 0x2f8   :  { %v808_v11 = vsel %vm804_vm5, %v803_v10, -inf }
 0x2f9   :  { %809 = vmax.xlane.f32.xlu1 %v808_v11  ;;  %v1323_v11 = vld [vmem:[%s3374_s6] sm:$0xff] }
 0x30a   :  { %827 = vrot.lane.b32.xlu1 %v3064_v42, %s2754_s3 }
 0x30e   :  { %903 = vrot.lane.b32.xlu1 %v3068_v43, %s2754_s3 }
 0x312   :  { %981 = vrot.lane.b32.xlu1 %v3064_v42, %s2755_s26 }
 0x316   :  { %1059 = vrot.lane.b32.xlu1 %v3068_v43, %s2755_s26 }
 0x382   :  { %v807_v12 = vpop.xlane.xlu1 %806 }
 0x383   :  { %v811_v13 = vsub.f32 %v802_v4, %v807_v12 }
 0x385   :  { %v813_v14 = vmul.f32 1.442695, %v811_v13  ;;  %v1325_v13 = vld [vmem:[%s3374_s6 + $0x10] sm:$0xff] }
 0x386   :  { %v810_v15 = vpop.xlane.xlu1 %809 }
 0x387   :  { %2482 = vpow2.f32 %v813_v14  ;;  %v812_v16 = vsub.f32 %v803_v10, %v810_v15  ;;  %v1326_v14 = vld [vmem:[%s3374_s6 + $0x18] sm:$0xff] }
 0x388   :  { %v2366_v15 = vpack.c.bf16 %v1326_v14, %v1325_v13  ;;  %v2059_v13 = vld [vmem:[#allocation13] ss:$0 sm:$0xff] }
 0x389   :  { %v815_v17 = vmul.f32 1.442695, %v812_v16 }
 0x38a   :  { %v828_v18 = vpop.permute.xlu1 %827 }
 0x38b   :  { %2484 = vpow2.f32 %v815_v17  ;;  %2260 = vmatpush3.msra.mxu0 %v828_v18 }
 0x38c   :  { %2269 = vmatprep.subr.mxu0 %v2751_v1 }
 0x38e   :  { %v904_v19 = vpop.permute.xlu1 %903 }
 0x38f   :  { %2265 = vmatpush3.msra.mxu1 %v904_v19 }
 0x390   :  { %2274 = vmatprep.subr.mxu1 %v2751_v1 }
 0x391   :  { %v2483_v20 = vpop.eup %2482 }
 0x392   :  { %v817_v23 = vsel %vm804_vm5, %v2483_v20, 0.0  ;;  %v982_v26 = vpop.permute.xlu1 %981 }
 0x393   :  { %818 = vadd.xlane.f32.xlu0 %v817_v23 }
 0x395   :  { %v2485_v24 = vpop.eup %2484 }
 0x396   :  { %v820_v25 = vsel %vm804_vm5, %v2485_v24, 0.0  ;;  %v1060_v27 = vpop.permute.xlu1 %1059 }
 0x397   :  { %821 = vadd.xlane.f32.xlu1 %v820_v25 }
 0x3a8   :  { %1057 = vrot.lane.b32.xlu1 %v3068_v43, %s2756_s27 }
 0x3a9   :  { %979 = vrot.lane.b32.xlu0 %v3064_v42, %s2756_s27 }
 0x420   :  { %v819_v28 = vpop.xlane.xlu0 %818 }
 0x421   :  { %2486 = vrcp.f32 %v819_v28 }
 0x424   :  { %v822_v29 = vpop.xlane.xlu1 %821  ;;  %v980_v34 = vpop.permute.xlu0 %979 }
 0x425   :  { %2488 = vrcp.f32 %v822_v29 }
 0x428   :  { %v1058_v36 = vpop.permute.xlu1 %1057 }
 0x42b   :  { %v2487_v30 = vpop.eup %2486 }
 0x42c   :  { %v825_v31 = vmul.f32 %v2487_v30, %v2483_v20 }
 0x42e   :  { %2262 = vmatmul.mubr.msk.f32.vlgmr.msra.gmra.mrb[6].mxu0 %vm804_vm5, %v825_v31 }
 0x42f   :  { %v2489_v32 = vpop.eup %2488  ;;  %2270 = vmatpush3.xpose.msk.msra.mxu0 %vm636_vm2, %v982_v26  ;;  %2271 = vmatprep.mubr.msk.f32.mxu0 %vm2750_vm0, %v2751_v1  ;;  %v2083_v26 = vld [vmem:[#allocation7] ss:$0 sm:$0xff] }
 0x430   :  { %v826_v33 = vmul.f32 %v2489_v32, %v2485_v24  ;;  %2279 = vmatprep.subr.mxu0 %v2751_v1 }
 0x432   :  { %2267 = vmatmul.mubr.msk.f32.vlgmr.msra.gmra.mrb[8].mxu1 %vm804_vm5, %v826_v33  ;;  %2272 = vmatmul.mubr.msk.f32.vlgmr.msra.gmra.mrb[8].mxu0 %vm636_vm2, %v980_v34 }
 0x433   :  { %2275 = vmatpush3.xpose.msk.msra.mxu1 %vm636_vm2, %v1060_v27  ;;  %2276 = vmatprep.mubr.msk.f32.mxu1 %vm2750_vm0, %v2751_v1 }
 0x434   :  { %2284 = vmatprep.subr.mxu1 %v2751_v1  ;;  %2281 = vmatprep.mubr.msk.f32.mxu0 %vm2750_vm0, %v2751_v1 }
 0x436   :  { %2277 = vmatmul.mubr.msk.f32.vlgmr.msra.gmra.mrb[10].mxu1 %vm636_vm2, %v1058_v36  ;;  %v181_v36 = vld [vmem:[%s3402_s4] sm:$0xff] }
 0x437   :  { %2286 = vmatprep.mubr.msk.f32.mxu1 %vm2750_vm0, %v2751_v1 }
 0x501   :  { %v3137_v38 = vpop.f32.mrb[6].mxu0 }
 0x502   :  { %v2263_v39 = vpop.f32.mrb[7].mxu0 }
 0x505   :  { %v3139_v40 = vpop.f32.mrb[8].mxu1  ;;  %v1053_v41 = vpop.f32.mrb[8].mxu0 }
 0x506   :  { %v1135_v45 = vmul.f32 0.25, %v1053_v41  ;;  %v2268_v47 = vpop.f32.mrb[9].mxu1  ;;  %v2273_v48 = vpop.f32.mrb[9].mxu0 }
 0x508   :  { %v1137_v49 = vadd.f32 %v1135_v45, %v3099_v62 }
 0x509   :  { %v1131_v50 = vpop.f32.mrb[10].mxu1 }
 0x50a   :  { %v1136_v51 = vmul.f32 0.25, %v1131_v50  ;;  %v2278_v52 = vpop.f32.mrb[11].mxu1  ;;  %v1139_v53 = vsel %vm804_vm5, %v1137_v49, -inf }
 0x50b   :  { %1140 = vmax.xlane.f32.xlu1 %v1139_v53  ;;  %v1673_v52 = vld [vmem:[#allocation8 + $0x100] sm:$0xff]  ;;  %v1674_v53 = vld [vmem:[#allocation8 + $0x108] sm:$0xff] }
 0x50c   :  { %v1138_v54 = vadd.f32 %v1136_v51, %v3104_v5  ;;  %v182_v51 = vld [vmem:[%s3402_s4 + $0x8] sm:$0xff] }
 0x50e   :  { %v1142_v1 = vsel %vm804_vm5, %v1138_v54, -inf }
 0x50f   :  { %1143 = vmax.xlane.f32.xlu0 %v1142_v1  ;;  %v1675_v1 = vld [vmem:[#allocation8 + $0x110] sm:$0xff] }
 0x525   :  { %1237 = vrot.lane.b32.xlu0 %v3068_v43, %s2757_s7 }
 0x598   :  { %v1141_v55 = vpop.xlane.xlu1 %1140 }
 0x599   :  { %v1145_v57 = vsub.f32 %v1137_v49, %v1141_v55  ;;  %v1676_v55 = vld [vmem:[#allocation8 + $0x118] sm:$0xff] }
 0x59b   :  { %v1147_v58 = vmul.f32 1.442695, %v1145_v57  ;;  %v2406_v57 = vpack.c.bf16 %v1676_v55, %v1675_v1  ;;  %v1648_v1 = vld [vmem:[#allocation8 + $0x38] sm:$0xff] }
 0x59c   :  { %v1144_v59 = vpop.xlane.xlu0 %1143 }
 0x59d   :  { %2490 = vpow2.f32 %v1147_v58  ;;  %v1146_v60 = vsub.f32 %v1138_v54, %v1144_v59  ;;  %v2402_v54 = vpack.c.bf16 %v1674_v53, %v1673_v52  ;;  %v1657_v58 = vld [vmem:[#allocation8 + $0x80] sm:$0xff]  ;;  %v1658_v59 = vld [vmem:[#allocation8 + $0x88] sm:$0xff] }
 0x59f   :  { %v1149_v62 = vmul.f32 1.442695, %v1146_v60  ;;  %v1641_v60 = vld [vmem:[#allocation8] sm:$0xff] }
 0x5a0   :  { %v1238_v63 = vpop.permute.xlu0 %1237 }
 0x5a1   :  { %2492 = vpow2.f32 %v1149_v62  ;;  %2285 = vmatpush3.msra.mxu1 %v1238_v63  ;;  %v2370_v62 = vpack.c.bf16 %v1658_v59, %v1657_v58  ;;  %v1642_v63 = vld [vmem:[#allocation8 + $0x8] sm:$0xff] }
 0x5a3   :  { %2371 = vmatprep.subr.bf16.mxu1 %v2370_v62 }
 0x5a7   :  { %v2491_v0 = vpop.eup %2490 }
 0x5a8   :  { %v1151_v2 = vsel %vm804_vm5, %v2491_v0, 0.0 }
 0x5a9   :  { %1152 = vadd.xlane.f32.xlu1 %v1151_v2  ;;  %v1660_v2 = vld [vmem:[#allocation8 + $0x98] sm:$0xff] }
 0x5ab   :  { %v2493_v3 = vpop.eup %2492 }
 0x5ac   :  { %v1154_v4 = vsel %vm804_vm5, %v2493_v3, 0.0 }
 0x5ad   :  { %1155 = vadd.xlane.f32.xlu1 %v1154_v4 }
 0x5be   :  { %1161 = vrot.lane.b32.xlu1 %v3064_v42, %s2757_s7  ;;  %v1324_v42 = vld [vmem:[%s3374_s6 + $0x8] sm:$0xff] }
 0x5bf   :  { %v2362_v12 = vpack.c.bf16 %v1324_v42, %v1323_v11  ;;  %v1646_v11 = vld [vmem:[#allocation8 + $0x28] sm:$0xff] }
 0x636   :  { %v1153_v43 = vpop.xlane.xlu1 %1152 }
 0x637   :  { %2494 = vrcp.f32 %v1153_v43  ;;  %v1643_v43 = vld [vmem:[#allocation8 + $0x10] sm:$0xff] }
 0x63a   :  { %v1156_v5 = vpop.xlane.xlu1 %1155 }
 0x63b   :  { %2496 = vrcp.f32 %v1156_v5  ;;  %v1644_v5 = vld [vmem:[#allocation8 + $0x18] sm:$0xff] }
 0x63e   :  { %v1162_v6 = vpop.permute.xlu1 %1161 }
 0x63f   :  { %2280 = vmatpush3.msra.mxu0 %v1162_v6  ;;  %v1661_v6 = vld [vmem:[#allocation8 + $0xa0] sm:$0xff] }
 0x640   :  { %2363 = vmatprep.subr.bf16.mxu0 %v2362_v12 }
 0x641   :  { %v2495_v7 = vpop.eup %2494 }
 0x642   :  { %v1159_v8 = vmul.f32 %v2495_v7, %v2491_v0  ;;  %v1659_v0 = vld [vmem:[#allocation8 + $0x90] sm:$0xff]  ;;  %v1662_v7 = vld [vmem:[#allocation8 + $0xa8] sm:$0xff] }
 0x643   :  { %v2374_v4 = vpack.c.bf16 %v1660_v2, %v1659_v0 }
 0x644   :  { %2282 = vmatmul.mubr.msk.f32.vlgmr.msra.gmra.mrb[10].mxu0 %vm804_vm5, %v1159_v8  ;;  %v2376_v8 = vpack.c.bf16 %v1644_v5, %v1643_v43 }
 0x645   :  { %v2497_v9 = vpop.eup %2496  ;;  %2365 = vmatpush3.bf16.msra.mxu0 %v2362_v12 }
 0x646   :  { %v1160_v10 = vmul.f32 %v2497_v9, %v2493_v3  ;;  %2367 = vmatprep.subr.bf16.mxu0 %v2366_v15  ;;  %v2372_v3 = vpack.c.bf16 %v1642_v63, %v1641_v60  ;;  %v2378_v9 = vpack.c.bf16 %v1662_v7, %v1661_v6 }
 0x648   :  { %2287 = vmatmul.mubr.msk.f32.vlgmr.msra.gmra.mrb[12].mxu1 %vm804_vm5, %v1160_v10  ;;  %v1645_v10 = vld [vmem:[#allocation8 + $0x20] sm:$0xff] }
 0x649   :  { %2369 = vmatpush3.bf16.msra.mxu0 %v2366_v15  ;;  %2373 = vmatpush3.bf16.msra.mxu1 %v2372_v3  ;;  %v2380_v42 = vpack.c.bf16 %v1646_v11, %v1645_v10  ;;  %v2061_v15 = vld [vmem:[%s3383_s15] ss:$0 sm:$0xff]  ;;  %v1649_v11 = vld [vmem:[#allocation8 + $0x40] sm:$0xff]  ;;  %s2760_s15 = smov 32  }
 0x64a   :  { %2403 = vmatprep.subr.bf16.mxu0 %v2402_v54  ;;  %2375 = vmatprep.subr.bf16.mxu1 %v2374_v4  ;;  %v1666_v10 = vld [vmem:[#allocation8 + $0xc8] sm:$0xff] }
 0x64d   :  { %2377 = vmatpush3.bf16.msra.mxu1 %v2376_v8 }
 0x64e   :  { %2379 = vmatprep.subr.bf16.mxu1 %v2378_v9  ;;  %v1665_v9 = vld [vmem:[#allocation8 + $0xc0] sm:$0xff] }
 0x651   :  { %2381 = vmatpush3.bf16.msra.mxu1 %v2380_v42 }
 0x717   :  { %v1233_v16 = vpop.f32.mrb[10].mxu0 }
 0x718   :  { %1315 = vrot.lane.b32.xlu1 %v1233_v16, %s2758_s24  ;;  %v2283_v17 = vpop.f32.mrb[11].mxu0 }
 0x719   :  { %v266_v17 = vadd.f32 %v2059_v13, %v3057_v35 }
 0x71b   :  { %v1309_v18 = vpop.f32.mrb[12].mxu1 }
 0x71c   :  { %1317 = vrot.lane.b32.xlu1 %v1309_v18, %s2758_s24  ;;  %v2288_v19 = vpop.f32.mrb[13].mxu1 }
 0x78a   :  { %v1316_v20 = vpop.permute.xlu1 %1315 }
 0x78b   :  { %v1321_v23 = vsel %vm636_vm2, %v3137_v38, %v1316_v20  ;;  %v2759_v38 = vmov 0   ;;  %v347_v20 = vadd.f32 %v2061_v15, %v3072_v44  ;;  %v1667_v15 = vld [vmem:[#allocation8 + $0xd0] sm:$0xff] }
 0x78c   :  { %2297 = vmatprep.mubr.msk.f32.mxu0 %vm195_vm1, %v1321_v23  ;;  %2450 = vset.pattern.permute.xlu1 %v2759_v38 }
 0x78d   :  { %2451 = vset.pattern.permute.xlu0 %v2759_v38 }
 0x78e   :  { %v1318_v24 = vpop.permute.xlu1 %1317 }
 0x78f   :  { %v1322_v25 = vsel %vm636_vm2, %v3139_v40, %v1318_v24  ;;  %v1451_v24 = vrot.slane %v266_v17, %v3091_v56 }
 0x790   :  { %2298 = vmatmul.mubr.msk.f32.vlgmr.msra.gmra.mrb[12].mxu0 %vm195_vm1, %v1322_v25  ;;  %v1486_v25 = vrot.slane %v347_v20, %v3091_v56 }
 0x791   :  { %2405 = vmatpush3.bf16.msra.mxu0 %v2402_v54 }
 0x792   :  { %2407 = vmatprep.subr.bf16.mxu0 %v2406_v57 }
 0x795   :  { %2409 = vmatpush3.bf16.msra.mxu0 %v2406_v57 }
 0x863   :  { %v2299_v27 = vpop.f32.mrb[12].mxu0 }
 0x864   :  { %v1412_v28 = vadd.f32 %v2299_v27, %v2083_v26  ;;  %v1406_v29 = vpop.f32.mrb[13].mxu0  ;;  %v1459_v27 = vrot.slane %v1451_v24, %v3091_v56 }
 0x865   :  { %v1407_v30 = vadd.f32 %v2083_v26, %v1406_v29  ;;  %v1452_v26 = vcombine.high %v1451_v24, %v1451_v24  ;;  %v1494_v29 = vrot.slane %v1486_v25, %v3091_v56 }
 0x866   :  { %v1416_v31 = vadd.f32 %v1412_v28, %v3028_v22  ;;  %v1487_v28 = vcombine.high %v1486_v25, %v1486_v25 }
 0x867   :  { %v1415_v32 = vadd.f32 %v1407_v30, %v3023_v21  ;;  %v1466_v35 = vrot.slane %v1452_v26, %v3091_v56  ;;  %v1651_v26 = vld [vmem:[#allocation8 + $0x50] sm:$0xff] }
 0x868   :  { %v1420_v33 = vsel %vm195_vm1, %v1416_v31, 0.0  ;;  %v1501_v44 = vrot.slane %v1487_v28, %v3091_v56 }
 0x869   :  { %1421 = vadd.xlane.f32.xlu1 %v1420_v33  ;;  %v1417_v34 = vsel %vm195_vm1, %v1415_v32, 0.0  ;;  %v1505_v33 = vrot.slane %v1494_v29, %v3096_v61 }
 0x86a   :  { %1418 = vadd.xlane.f32.xlu0 %v1417_v34 }
 0x87a   :  { %1516 = vperm.xlu1 %2450, %v181_v36  }
 0x8f6   :  { %v1422_v39 = vpop.xlane.xlu1 %1421 }
 0x8f7   :  { %v1425_v40 = vmul.f32 0.03125, %v1422_v39  ;;  %v1419_v41 = vpop.xlane.xlu0 %1418 }
 0x8f8   :  { %v1424_v22 = vmul.f32 0.03125, %v1419_v41  ;;  %v1474_v41 = vrot.slane %v1466_v35, %v3096_v61 }
 0x8f9   :  { %v3176_v45 = vsub.f32 %v1416_v31, %v1425_v40  ;;  %v1470_v31 = vrot.slane %v1459_v27, %v3096_v61  ;;  %v1652_v27 = vld [vmem:[#allocation8 + $0x58] sm:$0xff] }
 0x8fa   :  { %v3178_v21 = vsub.f32 %v1415_v32, %v1424_v22  ;;  %v3203_v38 = vpop.permute.xlu1 %1516 }
 0x8fb   :  { %v1429_v49 = vmul.f32 %v3176_v45, %v3176_v45 }
 0x8fc   :  { %v1428_v47 = vmul.f32 %v3178_v21, %v3178_v21 }
 0x8fd   :  { %v1433_v50 = vsel %vm195_vm1, %v1429_v49, 0.0  ;;  %v1663_v49 = vld [vmem:[#allocation8 + $0xb0] sm:$0xff] }
 0x8fe   :  { %v1430_v48 = vsel %vm195_vm1, %v1428_v47, 0.0 }
 0x8ff   :  { %1431 = vadd.xlane.f32.xlu0 %v1430_v48  ;;  %v1509_v48 = vrot.slane %v1501_v44, %v3096_v61 }
 0x903   :  { %1434 = vadd.xlane.f32.xlu0 %v1433_v50  ;;  %v1664_v50 = vld [vmem:[#allocation8 + $0xb8] sm:$0xff] }
 0x904   :  { %v2382_v54 = vpack.c.bf16 %v1664_v50, %v1663_v49  ;;  %v1653_v50 = vld [vmem:[#allocation8 + $0x60] sm:$0xff] }
 0x906   :  { %2383 = vmatprep.subr.bf16.mxu1 %v2382_v54  ;;  %v1671_v54 = vld [vmem:[#allocation8 + $0xf0] sm:$0xff] }
 0x919   :  { %1521 = vperm.xlu0 %2451, %v182_v51   ;;  %v1647_v51 = vld [vmem:[#allocation8 + $0x30] sm:$0xff] }
 0x98c   :  { %v1432_v12 = vpop.xlane.xlu0 %1431 }
 0x98d   :  { %v1436_v14 = vmul.f32 0.03125, %v1432_v12 }
 0x98f   :  { %v1438_v16 = vadd.f32 1e-05, %v1436_v14  ;;  %v1650_v14 = vld [vmem:[#allocation8 + $0x48] sm:$0xff] }
 0x990   :  { %v1435_v18 = vpop.xlane.xlu0 %1434  ;;  %v2388_v24 = vpack.c.bf16 %v1650_v14, %v1649_v11 }
 0x991   :  { %2498 = vrsqrt.f32 %v1438_v16  ;;  %v1437_v19 = vmul.f32 0.03125, %v1435_v18  ;;  %v1668_v16 = vld [vmem:[#allocation8 + $0xd8] sm:$0xff] }
 0x992   :  { %v2390_v25 = vpack.c.bf16 %v1668_v16, %v1667_v15 }
 0x993   :  { %v1439_v23 = vadd.f32 1e-05, %v1437_v19 }
 0x995   :  { %2500 = vrsqrt.f32 %v1439_v23  ;;  %v2386_v23 = vpack.c.bf16 %v1666_v10, %v1665_v9 }
 0x99b   :  { %v2499_v30 = vpop.eup %2498 }
 0x99c   :  { %v1442_v32 = vmul.f32 %v2499_v30, %v3178_v21  ;;  %v3211_v21 = vpop.permute.xlu0 %1521 }
 0x99e   :  { %v1477_v34 = vmul.f32 %v1470_v31, %v1442_v32  ;;  %v1669_v31 = vld [vmem:[#allocation8 + $0xe0] sm:$0xff]  ;;  %v1670_v32 = vld [vmem:[#allocation8 + $0xe8] sm:$0xff] }
 0x99f   :  { %v2501_v36 = vpop.eup %2500  ;;  %v2394_v49 = vpack.c.bf16 %v1670_v32, %v1669_v31 }
 0x9a0   :  { %v1512_v39 = vadd.f32 %v1505_v33, %v1477_v34  ;;  %v1443_v40 = vmul.f32 %v2501_v36, %v3176_v45  ;;  %v2384_v45 = vpack.c.bf16 %v1648_v1, %v1647_v51  ;;  %v1654_v51 = vld [vmem:[#allocation8 + $0x68] sm:$0xff]  ;;  %v1672_v1 = vld [vmem:[#allocation8 + $0xf8] sm:$0xff] }
 0x9a2   :  { %v3208_v22 = vmul.f32 %v3203_v38, %v1512_v39  ;;  %v1478_v47 = vmul.f32 %v1474_v41, %v1443_v40  ;;  %2385 = vmatpush3.bf16.msra.mxu1 %v2384_v45  ;;  %v2392_v39 = vpack.c.bf16 %v1652_v27, %v1651_v26 }
 0x9a3   :  { %2387 = vmatprep.subr.bf16.mxu1 %v2386_v23 }
 0x9a4   :  { %v1528_v52 = vrot.slane %v3208_v22, 4  ;;  %v1513_v53 = vadd.f32 %v1509_v48, %v1478_v47 }
 0x9a6   :  { %v3215_v55 = vsel %vm1532_vm6, %v1528_v52, 0.0  ;;  %v3218_v57 = vmul.f32 %v3211_v21, %v1513_v53  ;;  %v3224_v59 = vsel %vm1532_vm6, 0.0, %v1528_v52  ;;  %2389 = vmatpush3.bf16.msra.mxu1 %v2388_v24 }
 0x9a7   :  { %2308 = vmatprep.mubr.msk.f32.mxu0 %vm195_vm1, %v3215_v55  ;;  %v1542_v12 = vrot.slane %v3224_v59, 1  ;;  %v1543_v13 = vrot.slane %v3215_v55, 1  ;;  %v1589_v19 = vrot.slane %v3224_v59, 5  ;;  %v1590_v20 = vrot.slane %v3215_v55, 5  ;;  %2391 = vmatprep.subr.bf16.mxu1 %v2390_v25 }
 0x9a8   :  { %v1529_v58 = vrot.slane %v3218_v57, 4  ;;  %v1555_v29 = vrot.slane %v3224_v59, 2  ;;  %v1556_v30 = vrot.slane %v3215_v55, 2  ;;  %v1602_v35 = vrot.slane %v3224_v59, 6 }
 0x9a9   :  { %v1544_v44 = vsel %vm1541_vm7, %v1542_v12, %v1543_v13  ;;  %v1591_v33 = vsel %vm1588_vm8, %v1589_v19, %v1590_v20  ;;  %v1603_v34 = vrot.slane %v3215_v55, 6  ;;  %v1580_v36 = vrot.slane %v3224_v59, 4 }
 0x9aa   :  { %v3227_v60 = vsel %vm1532_vm6, 0.0, %v1529_v58  ;;  %v3230_v62 = vsel %vm1532_vm6, %v1529_v58, 0.0  ;;  %v1581_v40 = vrot.slane %v3215_v55, 4  ;;  %v1568_v48 = vrot.slane %v3224_v59, 3  ;;  %2393 = vmatpush3.bf16.msra.mxu1 %v2392_v39 }
 0x9ab   :  { %2309 = vmatmul.mubr.msk.f32.vlgmr.msra.gmra.mrb[14].mxu0 %vm195_vm1, %v3230_v62  ;;  %v1545_v63 = vrot.slane %v3227_v60, 1  ;;  %v1546_v0 = vrot.slane %v3230_v62, 1  ;;  %v1592_v2 = vrot.slane %v3227_v60, 5  ;;  %v1593_v3 = vrot.slane %v3230_v62, 5  ;;  %2395 = vmatprep.subr.bf16.mxu1 %v2394_v49 }
 0x9ac   :  { %v1558_v4 = vrot.slane %v3227_v60, 2  ;;  %v1559_v43 = vrot.slane %v3230_v62, 2  ;;  %v1605_v5 = vrot.slane %v3227_v60, 6  ;;  %v1606_v6 = vrot.slane %v3230_v62, 6 }
 0x9ad   :  { %v1547_v7 = vsel %vm1541_vm7, %v1545_v63, %v1546_v0  ;;  %v1594_v8 = vsel %vm1588_vm8, %v1592_v2, %v1593_v3  ;;  %v1583_v41 = vrot.slane %v3227_v60, 4  ;;  %v1584_v47 = vrot.slane %v3230_v62, 4 }
 0x9ae   :  { %v2452_v42 = vpack.i.bf16 %v1547_v7, %v1594_v8  ;;  %v1560_v17 = vsel %vm1554_vm9, %v1558_v4, %v1559_v43  ;;  %v1607_v18 = vsel %vm1601_vm10, %v1605_v5, %v1606_v6  ;;  %v2462_v52 = vpack.i.bf16 %v1544_v44, %v1591_v33  ;;  %v1655_v5 = vld [vmem:[#allocation8 + $0x70] sm:$0xff]  ;;  %v1656_v6 = vld [vmem:[#allocation8 + $0x78] sm:$0xff] }
 0x9af   :  { %v2457_v28 = vpack.i.bf16 %v1560_v17, %v1607_v18  ;;  %v1569_v53 = vrot.slane %v3215_v55, 3  ;;  %v1582_v45 = vsel %vm1532_vm6, %v1580_v36, %v1581_v40  ;;  %v3266_v58 = vsel %vm1532_vm6, %v1583_v41, %v1584_v47  ;;  %v1841_v17 = vld [vmem:[%s3378_s10 + $0x8] sm:$0xff] }
 0x9b0   :  { %2453 = vrot.lane.b32.xlu1 %v2452_v42, %s2760_s15  ;;  %v1557_v63 = vsel %vm1554_vm9, %v1555_v29, %v1556_v30  ;;  %v1604_v0 = vsel %vm1601_vm10, %v1602_v35, %v1603_v34  ;;  %v1615_v2 = vrot.slane %v3224_v59, 7  ;;  %v1616_v3 = vrot.slane %v3215_v55, 7 }
 0x9b1   :  { %v2396_v4 = vpack.c.bf16 %v1654_v51, %v1653_v50  ;;  %v2398_v43 = vpack.c.bf16 %v1672_v1, %v1671_v54  ;;  %v2467_v7 = vpack.i.bf16 %v1557_v63, %v1604_v0  ;;  %v1570_v8 = vsel %vm1567_vm11, %v1568_v48, %v1569_v53  ;;  %v1842_v0 = vld [vmem:[%s3378_s10 + $0x10] sm:$0xff] }
 0x9b2   :  { %v1571_v9 = vrot.slane %v3227_v60, 3  ;;  %v1617_v10 = vsel %vm1614_vm12, %v1615_v2, %v1616_v3  ;;  %v1572_v11 = vrot.slane %v3230_v62, 3  ;;  %v1618_v55 = vrot.slane %v3227_v60, 7  ;;  %v1844_v2 = vld [vmem:[%s3378_s10 + $0x20] sm:$0xff]  ;;  %v1845_v3 = vld [vmem:[%s3378_s10 + $0x28] sm:$0xff] }
 0x9b3   :  { %v1619_v42 = vrot.slane %v3230_v62, 7  ;;  %2397 = vmatpush3.bf16.msra.mxu1 %v2396_v4  ;;  %v2400_v12 = vpack.c.bf16 %v1656_v6, %v1655_v5  ;;  %v2472_v13 = vpack.i.bf16 %v1570_v8, %v1617_v10  ;;  %v1840_v62 = vld [vmem:[%s3378_s10] sm:$0xff]  ;;  %v1846_v4 = vld [vmem:[%s3378_s10 + $0x30] sm:$0xff]  ;;  %v1847_v5 = vld [vmem:[%s3378_s10 + $0x38] sm:$0xff] }
 0x9b4   :  { %2458 = vrot.lane.b32.xlu1 %v2457_v28, %s2754_s3  ;;  %2399 = vmatprep.subr.bf16.mxu1 %v2398_v43  ;;  %v1573_v14 = vsel %vm1567_vm11, %v1571_v9, %v1572_v11  ;;  %v2410_v18 = vpack.c.bf16 %v1841_v17, %v1840_v62  ;;  %v2418_v43 = vpack.c.bf16 %v1845_v3, %v1844_v2  ;;  %v2086_v8 = vld [vmem:[#allocation10] ss:$0 sm:$0xff]  ;;  %v2089_v17 = vld [vmem:[#allocation11] ss:$0 sm:$0xff] }
 0x9b5   :  { %v1620_v15 = vsel %vm1614_vm12, %v1618_v55, %v1619_v42  ;;  %v2422_v6 = vpack.c.bf16 %v1847_v5, %v1846_v4 }
 0x9b6   :  { %v2477_v16 = vpack.i.bf16 %v1573_v14, %v1620_v15  ;;  %2411 = vmatprep.subr.bf16.mxu0 %v2410_v18 }
 0x9b7   :  { %2401 = vmatpush3.bf16.msra.mxu1 %v2400_v12  ;;  %2413 = vmatpush3.bf16.msra.mxu0 %v2410_v18 }
 0x9b8   :  { %2463 = vrot.lane.b32.xlu1 %v2462_v52, %s2760_s15 }
 0x9bc   :  { %2468 = vrot.lane.b32.xlu1 %v2467_v7, %s2754_s3 }
 0x9c0   :  { %2473 = vrot.lane.b32.xlu1 %v2472_v13, %s2752_s25 }
 0x9c4   :  { %2478 = vrot.lane.b32.xlu1 %v2477_v16, %s2752_s25 }
 0xa22   :  { %v2454_v19 = vpop.permute.xlu1 %2453 }
 0xa23   :  { %v2456_v29 = vunpack.i.h.bf16 %v2454_v19  ;;  %v2455_v30 = vunpack.i.l.bf16 %v2454_v19 }
 0xa25   :  { %v1628_v51 = vsel %vm195_vm1, %v3227_v60, %v2456_v29  ;;  %v1843_v60 = vld [vmem:[%s3378_s10 + $0x18] sm:$0xff] }
 0xa26   :  { %v2459_v20 = vpop.permute.xlu1 %2458 }
 0xa27   :  { %v2461_v34 = vunpack.i.h.bf16 %v2459_v20  ;;  %v2460_v36 = vunpack.i.l.bf16 %v2459_v20 }
 0xa29   :  { %v1631_v53 = vsel %vm1629_vm13, %v1628_v51, %v2461_v34 }
 0xa2a   :  { %v2464_v23 = vpop.permute.xlu1 %2463 }
 0xa2b   :  { %v2466_v25 = vunpack.i.h.bf16 %v2464_v23  ;;  %v2465_v26 = vunpack.i.l.bf16 %v2464_v23 }
 0xa2d   :  { %v1627_v31 = vsel %vm195_vm1, %v3224_v59, %v2466_v25  ;;  %v1635_v33 = vsel %vm195_vm1, %v1582_v45, %v2465_v26  ;;  %v1636_v59 = vsel %vm195_vm1, %v3266_v58, %v2455_v30  ;;  %v2414_v58 = vpack.c.bf16 %v1843_v60, %v1842_v0 }
 0xa2e   :  { %v2469_v24 = vpop.permute.xlu1 %2468  ;;  %v1638_v52 = vsel %vm1629_vm13, %v1636_v59, %v2460_v36  ;;  %v2065_v36 = vld [vmem:[%s3387_s19] ss:$0 sm:$0xff] }
 0xa2f   :  { %v2471_v27 = vunpack.i.h.bf16 %v2469_v24  ;;  %v2470_v28 = vunpack.i.l.bf16 %v2469_v24  ;;  %2415 = vmatprep.subr.bf16.mxu0 %v2414_v58 }
 0xa30   :  { %2417 = vmatpush3.bf16.msra.mxu0 %v2414_v58 }
 0xa31   :  { %v1637_v39 = vsel %vm1629_vm13, %v1635_v33, %v2470_v28  ;;  %v1630_v40 = vsel %vm1629_vm13, %v1627_v31, %v2471_v27  ;;  %2419 = vmatprep.subr.bf16.mxu0 %v2418_v43 }
 0xa32   :  { %v2474_v35 = vpop.permute.xlu1 %2473 }
 0xa33   :  { %v2476_v32 = vunpack.i.h.bf16 %v2474_v35  ;;  %v2475_v44 = vunpack.i.l.bf16 %v2474_v35 }
 0xa34   :  { %2421 = vmatpush3.bf16.msra.mxu0 %v2418_v43 }
 0xa35   :  { %v1639_v41 = vsel %vm1632_vm14, %v1637_v39, %v2475_v44  ;;  %v1633_v47 = vsel %vm1632_vm14, %v1630_v40, %v2476_v32  ;;  %2423 = vmatprep.subr.bf16.mxu0 %v2422_v6 }
 0xa36   :  { %v2479_v48 = vpop.permute.xlu1 %2478  ;;  %1752 = vmatprep.mubr.f32.mxu1 %v1639_v41 }
 0xa37   :  { %v2481_v49 = vunpack.i.h.bf16 %v2479_v48  ;;  %v2480_v50 = vunpack.i.l.bf16 %v2479_v48  ;;  %1753 = vmatmul.mubr.f32.vlgmr.msra.gmra.mrb[14].mxu1 %v1633_v47  ;;  %v509_v48 = vadd.f32 %v2065_v36, %v3074_v46 }
 0xa38   :  { %2425 = vmatpush3.bf16.msra.mxu0 %v2422_v6 }
 0xa39   :  { %v1640_v54 = vsel %vm1632_vm14, %v1638_v52, %v2480_v50  ;;  %v1634_v1 = vsel %vm1632_vm14, %v1631_v53, %v2481_v49  ;;  %v2006_v52 = vrot.slane %v509_v48, %v3091_v56 }
 0xa3a   :  { %1757 = vmatprep.mubr.f32.mxu1 %v1640_v54 }
 0xa3b   :  { %1758 = vmatmul.mubr.f32.gmra.mrb[16].mxu1 %v1634_v1  ;;  %v2007_v54 = vcombine.high %v2006_v52, %v2006_v52  ;;  %v2014_v46 = vrot.slane %v2006_v52, %v3091_v56 }
 0xa3d   :  { %v2025_v5 = vrot.slane %v2014_v46, %v3096_v61 }
 0xa7e   :  { %v2310_v45 = vpop.f32.mrb[14].mxu0 }
 0xa7f   :  { %v1829_v63 = vpop.f32.mrb[15].mxu0 }
 0xb0a   :  { %v2172_v7 = vpop.f32.mrb[14].mxu1 }
 0xb0b   :  { %v2173_v9 = vpop.f32.mrb[15].mxu1 }
 0xb0c   :  { %v2174_v10 = vadd.f32 %v2173_v9, %v2172_v7 }
 0xb0e   :  { %v1755_v11 = vadd.f32 %v2174_v10, %v2086_v8  ;;  %v2175_v55 = vpop.f32.mrb[16].mxu1 }
 0xb0f   :  { %v2176_v42 = vpop.f32.mrb[17].mxu1 }
 0xb10   :  { %v1830_v12 = vadd.f32 %v1829_v63, %v1755_v11  ;;  %v2177_v13 = vadd.f32 %v2176_v42, %v2175_v55 }
 0xb12   :  { %v1838_v14 = vmax.f32 %v1830_v12, 0.0  ;;  %v1760_v15 = vadd.f32 %v2177_v13, %v2086_v8 }
 0xb14   :  { %v1835_v16 = vadd.f32 %v2310_v45, %v1760_v15  ;;  %2327 = vmatprep.mubr.msk.f32.mxu0 %vm1629_vm13, %v1838_v14  ;;  %v2021_v45 = vrot.slane %v2007_v54, %v3091_v56 }
 0xb16   :  { %v1839_v62 = vmax.f32 %v1835_v16, 0.0  ;;  %v2029_v4 = vrot.slane %v2021_v45, %v3096_v61 }
 0xb18   :  { %2328 = vmatmul.mubr.msk.f32.vlgmr.msra.gmra.mrb[16].mxu0 %vm1629_vm13, %v1839_v62 }
 0xbeb   :  { %v2329_v18 = vpop.f32.mrb[16].mxu0 }
 0xbec   :  { %v1933_v19 = vadd.f32 %v2329_v18, %v2089_v17  ;;  %v1927_v20 = vpop.f32.mrb[17].mxu0 }
 0xbed   :  { %v1928_v23 = vadd.f32 %v2089_v17, %v1927_v20 }
 0xbee   :  { %v1937_v24 = vadd.f32 %v1933_v19, %v3218_v57 }
 0xbef   :  { %v1936_v25 = vadd.f32 %v1928_v23, %v3208_v22  ;;  %v2063_v22 = vld [vmem:[%s3385_s17] ss:$0 sm:$0xff]  ;;  %s2761_s17 = smov [#allocation17]  }
 0xbf0   :  { %v1941_v26 = vsel %vm195_vm1, %v1937_v24, 0.0  ;;  %v428_v39 = vadd.f32 %v2063_v22, %v3059_v37  ;;  %s2043_s19 = sshll.u32 %s2761_s17, 4  ;;  %s2044_s19 = int_to_ptr.vmem [resolvable:$true] %s2043_s19 }
 0xbf1   :  { %1942 = vadd.xlane.f32.xlu0 %v1941_v26  ;;  %v1938_v27 = vsel %vm195_vm1, %v1936_v25, 0.0  ;;  %s2704_s4 = scalar_lea.vmem %s2044_s19, 256  ;;  %p2709_p3 = scmp.lt.s32.totalorder %s2044_s19, %s2044_s19 }
 0xbf2   :  { %1939 = vadd.xlane.f32.xlu1 %v1938_v27  ;;  %v1971_v59 = vrot.slane %v428_v39, %v3091_v56  ;;  %p2705_p2 = scmp.ne.s32.totalorder %s2044_s19, %s2704_s4  ;;  %p2710_p4 = scmp.lt.s32.totalorder %s2704_s4, %s2704_s4 }
 0xbf4   :  { %v1972_v53 = vcombine.high %v1971_v59, %v1971_v59  ;;  %v1979_v37 = vrot.slane %v1971_v59, %v3091_v56  ;;  %p2711_p5 = por %p2710_p4, %p2709_p3 }
 0xbf6   :  { %v1986_v1 = vrot.slane %v1972_v53, %v3091_v56  ;;  %v1990_v2 = vrot.slane %v1979_v37, %v3096_v61  ;;  %p2712_p6 = pnand %p2711_p5, %p2705_p2 }
 0xbf8   :  { %v1994_v60 = vrot.slane %v1986_v1, %v3096_v61 }
 0xc7e   :  { %v1943_v28 = vpop.xlane.xlu0 %1942 }
 0xc7f   :  { %v1945_v29 = vmul.f32 0.03125, %v1943_v28  ;;  %v1940_v30 = vpop.xlane.xlu1 %1939 }
 0xc80   :  { %v1944_v35 = vmul.f32 0.03125, %v1940_v30 }
 0xc81   :  { %v1947_v31 = vsub.f32 %v1937_v24, %v1945_v29 }
 0xc82   :  { %v1946_v32 = vsub.f32 %v1936_v25, %v1944_v35 }
 0xc83   :  { %v1949_v44 = vmul.f32 %v1947_v31, %v1947_v31 }
 0xc84   :  { %v1948_v33 = vmul.f32 %v1946_v32, %v1946_v32 }
 0xc85   :  { %v1953_v34 = vsel %vm195_vm1, %v1949_v44, 0.0 }
 0xc86   :  { %1954 = vadd.xlane.f32.xlu0 %v1953_v34  ;;  %v1950_v57 = vsel %vm195_vm1, %v1948_v33, 0.0 }
 0xc87   :  { %1951 = vadd.xlane.f32.xlu1 %v1950_v57 }
 0xd13   :  { %v1955_v40 = vpop.xlane.xlu0 %1954 }
 0xd14   :  { %v1957_v41 = vmul.f32 0.03125, %v1955_v40  ;;  %v1952_v47 = vpop.xlane.xlu1 %1951 }
 0xd15   :  { %v1956_v49 = vmul.f32 0.03125, %v1952_v47 }
 0xd16   :  { %v1959_v50 = vadd.f32 1e-05, %v1957_v41 }
 0xd17   :  { %v1958_v51 = vadd.f32 1e-05, %v1956_v49 }
 0xd18   :  { %2502 = vrsqrt.f32 %v1959_v50 }
 0xd19   :  { %2504 = vrsqrt.f32 %v1958_v51 }
 0xd22   :  { %v2503_v63 = vpop.eup %2502 }
 0xd23   :  { %v2505_v0 = vpop.eup %2504  ;;  %v1963_v58 = vmul.f32 %v2503_v63, %v1947_v31 }
 0xd24   :  { %v1962_v3 = vmul.f32 %v2505_v0, %v1946_v32 }
 0xd25   :  { %v1998_v43 = vmul.f32 %v1994_v60, %v1963_v58 }
 0xd26   :  { %v1997_v6 = vmul.f32 %v1990_v2, %v1962_v3 }
 0xd27   :  { %v2033_v7 = vadd.f32 %v2029_v4, %v1998_v43 }
 0xd28   :  { %v2032_v8 = vadd.f32 %v2025_v5, %v1997_v6 }
 0xd29   :  { %v2035_v9 = vmul.f32 %v2033_v7, %v3211_v21 }
 0xd2a   :  { %v2034_v56 = vmul.f32 %v2032_v8, %v3203_v38 }
 0xd2b   :  { %2037 = vst.msk [vmem:[#allocation17 + $0x8] sm:$0xff] %vm195_vm1, %v2035_v9 }
 0xd2c   :  { %2036 = vst.msk [vmem:[#allocation17] sm:$0xff] %vm195_vm1, %v2034_v56 }
 0xd2d   :  { %2715 = shalt.err (!%p2712_p6)
}
 0xd2e   :  { %s2716_s14 = scalar_lea.hbm %s3388_s20, 256 }
 0xd2f   :  { %p2717_p7 = scmp.ne.s32.totalorder %s3388_s20, %s2716_s14  ;;  %p2720_p8 = scmp.lt.u32.totalorder %s2716_s14, %s3388_s20 }
 0xd31   :  { %p2722_p9 = pnand %p2720_p8, %p2717_p7 }
 0xd33   :  { %2725 = shalt.err (!%p2722_p9)
}
 0xd34   :  { %2049 = dma.vmem_to_hbm [thread:$0]  %s2044_s19, 256, %s3388_s20, [#allocation4], %s2741_s2, %s2741_s2, %s2742_s29  }
 0xd35   :  { %2736 = dma.done.wait [#allocation4], 256  }
 0xd36   :  { %2737 = vsyncadd [#allocation4], 4294967040 }
 0xd37   :  { %2053 = vsyncpa [#allocation3], 1 }
 0xd38   :  { %2054 = vsyncpa [#allocation6], 1 }
 0xd39   :  { %2055 = vsyncpa [#allocation9], 1 }
 0xd3a   :  { %2056 = vsyncpa [#allocation12], 1 }
 0xd3b   :  { %2057 = vsyncpa [#allocation15], 1 }
 0xd3c   :  { %2058 = vsyncpa [#allocation4], 1 }

</bundles_post_ra>
